<compile_context>
chip_gen: v6e
topology: v6e:2x2x1
jax: 0.10.0
libtpu: 0.0.40
codegen_flags: <defaults>
</compile_context>

<pallas_src>
import math

import jax
import jax.numpy as jnp
from jax import lax
from jax.experimental import pallas as pl
from jax.experimental.pallas import tpu as pltpu


def _round_up(x, m):
    return (x + m - 1) // m * m


def _vmem_limit(need_bytes):
    """Scoped-VMEM limit: 2x headroom over the estimated working set, floored
    at 32 MiB (>= every generation's scoped default) and capped at v7x's
    64 MiB physical VMEM.  Re-derive per generation for production shapes."""
    return int(min(max(2 * need_bytes, 32 * 1024 * 1024), 64 * 1024 * 1024))


# ----------------------------------------------------------------------------
# Pallas kernel 1: tiled (matmul + bias).  Used for the hoisted x-projection
# and the hoisted fc1 vocab projection.  bf16 operands, f32 accumulation.
# ----------------------------------------------------------------------------
def _matmul_bias_kernel(x_ref, w_ref, b_ref, o_ref):
    acc = jnp.dot(x_ref[...], w_ref[...], preferred_element_type=jnp.float32)
    o_ref[...] = (acc + b_ref[...]).astype(o_ref.dtype)


def matmul_bias_pallas(x, w, b, out_dtype=jnp.float32, tm=256, tn=512):
    """x: [M, K] bf16, w: [K, N] bf16, b: [1, N] f32 -> [M, N] out_dtype.

    Tiled over (M, N); K (= E or Hp here, <= ~1k) stays resident per tile.
    (For much larger K, add a third "arbitrary" grid axis + f32 VMEM
    accumulator.)  Both grid axes are "parallel": independent output tiles,
    double-buffered DMA pipelining, and v7x megacore sharding of the work.
    """
    M, K = x.shape
    _, N = w.shape
    tm = M if M <= tm else tm          # full (small) M, or 256-row tiles
    tn = N if N <= tn else tn          # N tiles are multiples of 128 (<= 512)
    grid = (pl.cdiv(M, tm), pl.cdiv(N, tn))
    out_bytes = jnp.dtype(out_dtype).itemsize
    need = (2 * (tm * K * x.dtype.itemsize        # x tile  (double-buffered)
                 + K * tn * w.dtype.itemsize      # w tile
                 + tn * 4                         # bias tile
                 + tm * tn * out_bytes)           # out tile
            + tm * tn * 4)                        # f32 accumulator
    return pl.pallas_call(
        _matmul_bias_kernel,
        out_shape=jax.ShapeDtypeStruct((M, N), out_dtype),
        grid=grid,
        in_specs=[
            pl.BlockSpec((tm, K), lambda i, j: (i, 0)),
            pl.BlockSpec((K, tn), lambda i, j: (0, j)),
            pl.BlockSpec((1, tn), lambda i, j: (0, j)),
        ],
        out_specs=pl.BlockSpec((tm, tn), lambda i, j: (i, j)),
        compiler_params=pltpu.CompilerParams(
            dimension_semantics=("parallel", "parallel"),
            vmem_limit_bytes=_vmem_limit(need)),
    )(x, w, b)


# ----------------------------------------------------------------------------
# Pallas kernel 2: LSTM recurrence (only h_prev @ W_hh^T per step).
# gates_x (x projection incl. biases) is precomputed and streamed in chunks
# along time; h/c state persists in VMEM scratch across time chunks.
# ----------------------------------------------------------------------------
def _lstm_recurrence_kernel(gx_ref, whh_ref, h_out_ref, h_scr, c_scr):
    # gx_ref : [t_chunk, b_blk, 4*Hp] bf16   (gate order [i, f, o, g])
    # whh_ref: [Hp, 4*Hp]             bf16
    # h_out  : [t_chunk, b_blk, Hp]   bf16
    # h_scr/c_scr: [b_blk, Hp] f32 scratch carried across time chunks.
    t_chunk = gx_ref.shape[0]
    Hp = whh_ref.shape[0]

    # New batch block (first time chunk): reset the carried state.
    @pl.when(pl.program_id(1) == 0)
    def _():
        h_scr[...] = jnp.zeros_like(h_scr)
        c_scr[...] = jnp.zeros_like(c_scr)

    whh = whh_ref[...]                       # hoisted out of the time loop

    def step(t, carry):
        h_prev, c_prev = carry               # f32 state (held in vregs)
        gates = jnp.dot(h_prev.astype(jnp.bfloat16), whh,
                        preferred_element_type=jnp.float32)
        gates = gates + gx_ref[t].astype(jnp.float32)   # [b_blk, 4*Hp] f32
        # Gate order [i, f, o, g]: one fused sigmoid over 3*Hp lanes + one tanh
        # (f32 nonlinearities: correct on v5e; bf16 EUP is an optional v6e/v7x
        # tweak).  Gate slices are 128-lane aligned because H is padded to Hp.
        ifo = jax.nn.sigmoid(gates[:, :3 * Hp])
        g_g = jnp.tanh(gates[:, 3 * Hp:])
        i_g = ifo[:, :Hp]
        f_g = ifo[:, Hp:2 * Hp]
        o_g = ifo[:, 2 * Hp:]
        c_new = f_g * c_prev + i_g * g_g
        h_new = o_g * jnp.tanh(c_new)
        h_out_ref[t] = h_new.astype(h_out_ref.dtype)
        return (h_new, c_new)

    # Bounded unroll: full only for short chunks, partial otherwise, to bound
    # vreg live ranges / code size for long sequences.
    unroll = True if t_chunk <= 16 else 4
    h_fin, c_fin = lax.fori_loop(0, t_chunk, step, (h_scr[...], c_scr[...]),
                                 unroll=unroll)
    h_scr[...] = h_fin
    c_scr[...] = c_fin


def lstm_recurrence_pallas(gates_x, w_hh_t):
    """gates_x: [T, B, 4*Hp] bf16, w_hh_t: [Hp, 4*Hp] bf16 -> h: [T, B, Hp] bf16."""
    T, B, G = gates_x.shape
    Hp = w_hh_t.shape[0]

    # Batch block: split across v7x's two TensorCores only when each half
    # still fills >= 8 f32 sublanes; v5e/v6e (1 TC) effectively keep b_blk = B.
    # (For very large B*Hp, cap b_blk further to bound vreg pressure of the
    # carried h/c state.)
    b_blk = B // 2 if (B >= 16 and B % 2 == 0 and (B // 2) % 8 == 0) else B

    # Time chunk: stream gates_x / h through VMEM instead of keeping the whole
    # [T, B, 4*Hp] tensor resident (it would not fit at production sizes), and
    # let the gx DMA pipeline under the recurrence compute.
    t_chunk = T if T <= 64 else 32

    need = (2 * (t_chunk * b_blk * G * 2          # gx chunk (double-buffered)
                 + t_chunk * b_blk * Hp * 2)      # h chunk
            + Hp * G * 2                          # resident W_hh
            + 2 * b_blk * Hp * 4)                 # h/c scratch
    return pl.pallas_call(
        _lstm_recurrence_kernel,
        out_shape=jax.ShapeDtypeStruct((T, B, Hp), jnp.bfloat16),
        grid=(pl.cdiv(B, b_blk), pl.cdiv(T, t_chunk)),
        in_specs=[
            pl.BlockSpec((t_chunk, b_blk, G), lambda b, t: (t, b, 0)),
            pl.BlockSpec((Hp, G), lambda b, t: (0, 0)),
        ],
        out_specs=pl.BlockSpec((t_chunk, b_blk, Hp), lambda b, t: (t, b, 0)),
        scratch_shapes=[pltpu.VMEM((b_blk, Hp), jnp.float32),
                        pltpu.VMEM((b_blk, Hp), jnp.float32)],
        compiler_params=pltpu.CompilerParams(
            # batch blocks independent; time chunks carry h/c via scratch
            dimension_semantics=("parallel", "arbitrary"),
            vmem_limit_bytes=_vmem_limit(need)),
    )(gates_x, w_hh_t)


# ----------------------------------------------------------------------------
# Parameter init (mirrors the PyTorch module's init)
# ----------------------------------------------------------------------------
def init_params(key, embed_size, hidden_size, vocab_size):
    k_emb, k_fc, k_fcb, k_wih, k_whh, k_bih, k_bhh = jax.random.split(key, 7)

    def xavier_uniform(k, shape):
        fan_in, fan_out = shape[1], shape[0]
        a = math.sqrt(6.0 / (fan_in + fan_out))
        return jax.random.uniform(k, shape, jnp.float32, -a, a)

    def lstm_uniform(k, shape):
        a = 1.0 / math.sqrt(hidden_size)
        return jax.random.uniform(k, shape, jnp.float32, -a, a)

    return {
        "embedding": xavier_uniform(k_emb, (vocab_size, embed_size)),
        "w_ih": lstm_uniform(k_wih, (4 * hidden_size, embed_size)),   # [i,f,g,o]
        "w_hh": lstm_uniform(k_whh, (4 * hidden_size, hidden_size)),
        "b_ih": lstm_uniform(k_bih, (4 * hidden_size,)),
        "b_hh": lstm_uniform(k_bhh, (4 * hidden_size,)),
        "fc_w": xavier_uniform(k_fc, (vocab_size, hidden_size)),
        "fc_b": lstm_uniform(k_fcb, (vocab_size,)),
    }


# ----------------------------------------------------------------------------
# Weight preparation: transpose to gate-major [in, 4*Hp] layout, reorder gates
# [i,f,g,o] -> [i,f,o,g], zero-pad H->Hp / V->Vp (see padding invariant at the
# top), cast matmul weights to bf16 (biases stay f32).
# ----------------------------------------------------------------------------
def _prepare_weights(params, Hp, Vp):
    H = params["w_hh"].shape[1]
    V = params["fc_w"].shape[0]
    perm = jnp.array([0, 1, 3, 2])   # [i,f,g,o] -> [i,f,o,g]

    def gate_major(w):               # (4H, in_dim) -> (in_dim, 4*Hp)
        in_dim = w.shape[1]
        w4 = w.reshape(4, H, in_dim)[perm]
        w4 = jnp.pad(w4, ((0, 0), (0, Hp - H), (0, 0)))
        return jnp.transpose(w4, (2, 0, 1)).reshape(in_dim, 4 * Hp)

    w_ih_t = gate_major(params["w_ih"])                                  # (E, 4Hp)
    w_hh_t = jnp.pad(gate_major(params["w_hh"]), ((0, Hp - H), (0, 0)))  # (Hp, 4Hp)

    b_gates = (params["b_ih"] + params["b_hh"]).reshape(4, H)[perm]
    b_gates = jnp.pad(b_gates, ((0, 0), (0, Hp - H))).reshape(1, 4 * Hp)

    w_fc_t = jnp.pad(params["fc_w"].T, ((0, Hp - H), (0, Vp - V)))       # (Hp, Vp)
    b_fc = jnp.pad(params["fc_b"], (0, Vp - V)).reshape(1, Vp)

    return (w_ih_t.astype(jnp.bfloat16), w_hh_t.astype(jnp.bfloat16),
            b_gates, w_fc_t.astype(jnp.bfloat16), b_fc)


# ----------------------------------------------------------------------------
# Forward pass matching DecoderRNN.forward
# ----------------------------------------------------------------------------
def decoder_rnn_forward(params, features, captions):
    """features: [B, E] f32, captions: [B, S] int32 -> logits [B, S, V] f32."""
    captions = captions[:, :-1]                                  # [B, S-1]
    B = features.shape[0]
    E = params["embedding"].shape[1]
    H = params["w_hh"].shape[1]
    V = params["fc_w"].shape[0]
    Hp = _round_up(H, 128)
    Vp = _round_up(V, 128)
    T = captions.shape[1] + 1

    w_ih_t, w_hh_t, b_gates, w_fc_t, b_fc = _prepare_weights(params, Hp, Vp)

    # Build the LSTM input directly in time-major layout: gathering with the
    # transposed caption ids avoids a [B,T,E] -> [T,B,E] activation transpose.
    emb_tbe = params["embedding"][jnp.transpose(captions)]       # [S-1, B, E]
    x_tbe = jnp.concatenate([features[None, :, :], emb_tbe], axis=0)  # [T, B, E]

    # (1) hoisted input projection: tiled [T*B, E] x [E, 4*Hp] matmul, bf16 out.
    x_flat = x_tbe.reshape(T * B, E).astype(jnp.bfloat16)
    gates_x = matmul_bias_pallas(x_flat, w_ih_t, b_gates,
                                 out_dtype=jnp.bfloat16).reshape(T, B, 4 * Hp)

    # (2) serial recurrence (only h @ W_hh^T per step), time-chunked pipeline.
    h_states = lstm_recurrence_pallas(gates_x, w_hh_t)           # [T, B, Hp] bf16

    # (3) hoisted fc1 on batch-first flattened hidden states so the big logits
    # tensor is produced batch-first (no transpose of the large output).  The
    # small bf16 h transpose stays in XLA; folding it into the fc BlockSpec
    # index_map is a remaining optional optimization.
    h_flat = jnp.swapaxes(h_states, 0, 1).reshape(B * T, Hp)
    logits = matmul_bias_pallas(h_flat, w_fc_t, b_fc,
                                out_dtype=jnp.float32).reshape(B, T, Vp)
    return logits[:, :, :V]


# ----------------------------------------------------------------------------
# Pure-JAX reference (lax.scan LSTM) mirroring the kernel's numerics contract
# (bf16 matmul operands + bf16-stored gates_x / hidden states, f32 elsewhere).
# ----------------------------------------------------------------------------
def decoder_rnn_reference(params, features, captions):
    captions = captions[:, :-1]
    emb = params["embedding"][captions]
    x = jnp.concatenate([features[:, None, :], emb], axis=1)     # [B, T, E]
    B = x.shape[0]
    H = params["w_hh"].shape[1]
    bf = jnp.bfloat16
    wih_t = params["w_ih"].T.astype(bf)
    whh_t = params["w_hh"].T.astype(bf)
    wfc_t = params["fc_w"].T.astype(bf)
    bias = params["b_ih"] + params["b_hh"]

    x_tbe = jnp.transpose(x, (1, 0, 2))
    gx = (jnp.dot(x_tbe.astype(bf), wih_t, preferred_element_type=jnp.float32)
          + bias).astype(bf)                                     # bf16-stored gx

    def step(carry, gx_t):
        h, c = carry
        gates = gx_t.astype(jnp.float32) + jnp.dot(
            h.astype(bf), whh_t, preferred_element_type=jnp.float32)
        i, f, g, o = jnp.split(gates, 4, axis=-1)                # PyTorch order
        c = jax.nn.sigmoid(f) * c + jax.nn.sigmoid(i) * jnp.tanh(g)
        h = jax.nn.sigmoid(o) * jnp.tanh(c)
        return (h, c), h.astype(bf)

    init = (jnp.zeros((B, H), jnp.float32), jnp.zeros((B, H), jnp.float32))
    _, hs = lax.scan(step, init, gx)                             # [T, B, H] bf16
    logits = jnp.dot(hs, wfc_t, preferred_element_type=jnp.float32) + params["fc_b"]
    return jnp.transpose(logits, (1, 0, 2))                      # [B, T, V]


if __name__ == "__main__":
    batch = 2
    seq = 9            # captions length; LSTM length T = seq (1 feature step + seq-1 tokens)
    embed_size = 32
    hidden_size = 32
    vocab_size = 64

    key = jax.random.PRNGKey(0)
    k_params, k_feat, k_cap = jax.random.split(key, 3)

    params = init_params(k_params, embed_size, hidden_size, vocab_size)
    features = jax.random.normal(k_feat, (batch, embed_size), jnp.float32)
    captions = jax.random.randint(k_cap, (batch, seq), 0, vocab_size, jnp.int32)

    out = jax.jit(decoder_rnn_forward)(params, features, captions)
    out = jax.block_until_ready(out)

    ref = decoder_rnn_reference(params, features, captions)
    assert out.shape == (batch, seq, vocab_size), out.shape
    max_err = float(jnp.max(jnp.abs(out - ref)))
    assert jnp.allclose(out, ref, rtol=2e-3, atol=2e-3), max_err

    # TODO(synk): sample() (greedy autoregressive decode with data-dependent stop) not implemented.
    print("KERNEL_OK")
</pallas_src>

<mosaic_0001>
module attributes {stable_mosaic.version = 11 : i64} {
  func.func @_matmul_bias_kernel(%arg0: i32, %arg1: i32, %arg2: memref<18x32xbf16, #tpu.memory_space<vmem>>, %arg3: memref<32x512xbf16, #tpu.memory_space<vmem>>, %arg4: memref<1x512xf32, #tpu.memory_space<vmem>>, %arg5: memref<18x512xbf16, #tpu.memory_space<vmem>>) attributes {dimension_semantics = [#tpu.dimension_semantics<parallel>, #tpu.dimension_semantics<parallel>], iteration_bounds = array<i64: 1, 1>, scalar_prefetch = 0 : i64, scratch_operands = 0 : i64, tpu.core_type = #tpu.core_type<tc>, window_params = [{transform_indices = @transform_0, window_bounds = array<i64: 18, 32>}, {transform_indices = @transform_1, window_bounds = array<i64: 32, 512>}, {transform_indices = @transform_2, window_bounds = array<i64: 1, 512>}, {transform_indices = @transform_3, window_bounds = array<i64: 18, 512>}]} {
    %c0 = arith.constant 0 : index
    %c0_0 = arith.constant 0 : index
    %0 = vector.load %arg2[%c0, %c0_0] : memref<18x32xbf16, #tpu.memory_space<vmem>>, vector<18x32xbf16>
    %c0_1 = arith.constant 0 : index
    %c0_2 = arith.constant 0 : index
    %1 = vector.load %arg3[%c0_1, %c0_2] : memref<32x512xbf16, #tpu.memory_space<vmem>>, vector<32x512xbf16>
    %cst = arith.constant dense<0.000000e+00> : vector<18x512xf32>
    %2 = tpu.matmul %0, %1, %cst {dimension_numbers = #tpu.dot_dimension_numbers<[1], [0], [0], [1], [0, 0, 1, 1], [], []>} : vector<18x32xbf16>, vector<32x512xbf16>, vector<18x512xf32> -> vector<18x512xf32>
    %c0_3 = arith.constant 0 : index
    %c0_4 = arith.constant 0 : index
    %3 = vector.load %arg4[%c0_3, %c0_4] : memref<1x512xf32, #tpu.memory_space<vmem>>, vector<1x512xf32>
    %4 = vector.broadcast %3 : vector<1x512xf32> to vector<18x512xf32>
    %5 = arith.addf %2, %4 : vector<18x512xf32>
    %6 = arith.truncf %5 : vector<18x512xf32> to vector<18x512xbf16>
    %c0_5 = arith.constant 0 : index
    %c0_6 = arith.constant 0 : index
    %7 = vector.load %arg5[%c0_5, %c0_6] : memref<18x512xbf16, #tpu.memory_space<vmem>>, vector<18x512xbf16>
    tpu.vector_store %arg5[%c0_5, %c0_6], %6 {strides = array<i32>} : memref<18x512xbf16, #tpu.memory_space<vmem>>, vector<18x512xbf16>,
    return
  }
  func.func @transform_0(%arg0: i32, %arg1: i32) -> (i32, i32) {
    %c0_i32 = arith.constant 0 : i32
    %c0_i32_0 = arith.constant 0 : i32
    return %arg0, %c0_i32 : i32, i32
  }
  func.func @transform_1(%arg0: i32, %arg1: i32) -> (i32, i32) {
    %c0_i32 = arith.constant 0 : i32
    %c0_i32_0 = arith.constant 0 : i32
    return %c0_i32, %arg1 : i32, i32
  }
  func.func @transform_2(%arg0: i32, %arg1: i32) -> (i32, i32) {
    %c0_i32 = arith.constant 0 : i32
    %c0_i32_0 = arith.constant 0 : i32
    return %c0_i32, %arg1 : i32, i32
  }
  func.func @transform_3(%arg0: i32, %arg1: i32) -> (i32, i32) {
    %c0_i32 = arith.constant 0 : i32
    return %arg0, %arg1 : i32, i32
  }
}

module attributes {stable_mosaic.version = 11 : i64} {
  func.func @_lstm_recurrence_kernel(%arg0: i32, %arg1: i32, %arg2: memref<9x2x512xbf16, #tpu.memory_space<vmem>>, %arg3: memref<128x512xbf16, #tpu.memory_space<vmem>>, %arg4: memref<9x2x128xbf16, #tpu.memory_space<vmem>>, %arg5: memref<2x128xf32, #tpu.memory_space<vmem>>, %arg6: memref<2x128xf32, #tpu.memory_space<vmem>>) attributes {dimension_semantics = [#tpu.dimension_semantics<parallel>, #tpu.dimension_semantics<arbitrary>], iteration_bounds = array<i64: 1, 1>, scalar_prefetch = 0 : i64, scratch_operands = 2 : i64, tpu.core_type = #tpu.core_type<tc>, window_params = [{transform_indices = @transform_0, window_bounds = array<i64: 9, 2, 512>}, {pipeline_mode = #tpu.pipeline_mode<synchronous>, transform_indices = @transform_1, window_bounds = array<i64: 128, 512>}, {transform_indices = @transform_2, window_bounds = array<i64: 9, 2, 128>}]} {
    %c0_i32 = arith.constant 0 : i32
    %0 = arith.cmpi eq, %arg1, %c0_i32 : i32
    %1 = arith.extui %0 : i1 to i32
    %c0_i32_0 = arith.constant 0 : i32
    %2 = arith.cmpi ne, %1, %c0_i32_0 : i32
    scf.if %2 {
      %cst_64 = arith.constant 0.000000e+00 : f32
      %260 = vector.broadcast %cst_64 : f32 to vector<2x128xf32>
      %c0_65 = arith.constant 0 : index
      %c0_66 = arith.constant 0 : index
      %261 = vector.load %arg5[%c0_65, %c0_66] : memref<2x128xf32, #tpu.memory_space<vmem>>, vector<2x128xf32>
      tpu.vector_store %arg5[%c0_65, %c0_66], %260 {strides = array<i32>} : memref<2x128xf32, #tpu.memory_space<vmem>>, vector<2x128xf32>,
      %cst_67 = arith.constant 0.000000e+00 : f32
      %262 = vector.broadcast %cst_67 : f32 to vector<2x128xf32>
      %c0_68 = arith.constant 0 : index
      %c0_69 = arith.constant 0 : index
      %263 = vector.load %arg6[%c0_68, %c0_69] : memref<2x128xf32, #tpu.memory_space<vmem>>, vector<2x128xf32>
      tpu.vector_store %arg6[%c0_68, %c0_69], %262 {strides = array<i32>} : memref<2x128xf32, #tpu.memory_space<vmem>>, vector<2x128xf32>,
    } else {
    }
    %c0 = arith.constant 0 : index
    %c0_1 = arith.constant 0 : index
    %3 = vector.load %arg3[%c0, %c0_1] : memref<128x512xbf16, #tpu.memory_space<vmem>>, vector<128x512xbf16>
    %c0_2 = arith.constant 0 : index
    %c0_3 = arith.constant 0 : index
    %4 = vector.load %arg5[%c0_2, %c0_3] : memref<2x128xf32, #tpu.memory_space<vmem>>, vector<2x128xf32>
    %c0_4 = arith.constant 0 : index
    %c0_5 = arith.constant 0 : index
    %5 = vector.load %arg6[%c0_4, %c0_5] : memref<2x128xf32, #tpu.memory_space<vmem>>, vector<2x128xf32>
    %c0_i32_6 = arith.constant 0 : i32
    %6 = arith.truncf %4 : vector<2x128xf32> to vector<2x128xbf16>
    %cst = arith.constant dense<0.000000e+00> : vector<2x512xf32>
    %7 = tpu.matmul %6, %3, %cst {dimension_numbers = #tpu.dot_dimension_numbers<[1], [0], [0], [1], [0, 0, 1, 1], [], []>} : vector<2x128xbf16>, vector<128x512xbf16>, vector<2x512xf32> -> vector<2x512xf32>
    %8 = arith.index_cast %c0_i32_6 : i32 to index
    %c0_7 = arith.constant 0 : index
    %c0_8 = arith.constant 0 : index
    %9 = vector.load %arg2[%8, %c0_7, %c0_8] : memref<9x2x512xbf16, #tpu.memory_space<vmem>>, vector<1x2x512xbf16>
    %10 = vector.shape_cast %9 : vector<1x2x512xbf16> to vector<2x512xbf16>
    %11 = arith.extf %10 : vector<2x512xbf16> to vector<2x512xf32>
    %12 = arith.addf %7, %11 : vector<2x512xf32>
    %13 = vector.extract_strided_slice %12 {offsets = [0, 0], sizes = [2, 384], strides = [1, 1]} : vector<2x512xf32> to vector<2x384xf32>
    %14 = arith.negf %13 : vector<2x384xf32>
    %15 = math.exp %14 : vector<2x384xf32>
    %cst_9 = arith.constant 1.000000e+00 : f32
    %16 = vector.broadcast %cst_9 : f32 to vector<2x384xf32>
    %17 = arith.addf %16, %15 : vector<2x384xf32>
    %18 = arith.divf %16, %17 : vector<2x384xf32>
    %19 = vector.extract_strided_slice %12 {offsets = [0, 384], sizes = [2, 128], strides = [1, 1]} : vector<2x512xf32> to vector<2x128xf32>
    %20 = math.tanh %19 : vector<2x128xf32>
    %21 = vector.extract_strided_slice %18 {offsets = [0, 0], sizes = [2, 128], strides = [1, 1]} : vector<2x384xf32> to vector<2x128xf32>
    %22 = vector.extract_strided_slice %18 {offsets = [0, 128], sizes = [2, 128], strides = [1, 1]} : vector<2x384xf32> to vector<2x128xf32>
    %23 = vector.extract_strided_slice %18 {offsets = [0, 256], sizes = [2, 128], strides = [1, 1]} : vector<2x384xf32> to vector<2x128xf32>
    %24 = arith.mulf %22, %5 : vector<2x128xf32>
    %25 = arith.mulf %21, %20 : vector<2x128xf32>
    %26 = arith.addf %24, %25 : vector<2x128xf32>
    %27 = math.tanh %26 : vector<2x128xf32>
    %28 = arith.mulf %23, %27 : vector<2x128xf32>
    %29 = arith.truncf %28 : vector<2x128xf32> to vector<2x128xbf16>
    %30 = arith.index_cast %c0_i32_6 : i32 to index
    %c0_10 = arith.constant 0 : index
    %c0_11 = arith.constant 0 : index
    %31 = vector.load %arg4[%30, %c0_10, %c0_11] : memref<9x2x128xbf16, #tpu.memory_space<vmem>>, vector<1x2x128xbf16>
    %32 = vector.shape_cast %31 : vector<1x2x128xbf16> to vector<2x128xbf16>
    %33 = vector.shape_cast %29 : vector<2x128xbf16> to vector<1x2x128xbf16>
    tpu.vector_store %arg4[%30, %c0_10, %c0_11], %33 {strides = array<i32>} : memref<9x2x128xbf16, #tpu.memory_space<vmem>>, vector<1x2x128xbf16>,
    %c1_i32 = arith.constant 1 : i32
    %34 = arith.truncf %28 : vector<2x128xf32> to vector<2x128xbf16>
    %cst_12 = arith.constant dense<0.000000e+00> : vector<2x512xf32>
    %35 = tpu.matmul %34, %3, %cst_12 {dimension_numbers = #tpu.dot_dimension_numbers<[1], [0], [0], [1], [0, 0, 1, 1], [], []>} : vector<2x128xbf16>, vector<128x512xbf16>, vector<2x512xf32> -> vector<2x512xf32>
    %36 = arith.index_cast %c1_i32 : i32 to index
    %c0_13 = arith.constant 0 : index
    %c0_14 = arith.constant 0 : index
    %37 = vector.load %arg2[%36, %c0_13, %c0_14] : memref<9x2x512xbf16, #tpu.memory_space<vmem>>, vector<1x2x512xbf16>
    %38 = vector.shape_cast %37 : vector<1x2x512xbf16> to vector<2x512xbf16>
    %39 = arith.extf %38 : vector<2x512xbf16> to vector<2x512xf32>
    %40 = arith.addf %35, %39 : vector<2x512xf32>
    %41 = vector.extract_strided_slice %40 {offsets = [0, 0], sizes = [2, 384], strides = [1, 1]} : vector<2x512xf32> to vector<2x384xf32>
    %42 = arith.negf %41 : vector<2x384xf32>
    %43 = math.exp %42 : vector<2x384xf32>
    %cst_15 = arith.constant 1.000000e+00 : f32
    %44 = vector.broadcast %cst_15 : f32 to vector<2x384xf32>
    %45 = arith.addf %44, %43 : vector<2x384xf32>
    %46 = arith.divf %44, %45 : vector<2x384xf32>
    %47 = vector.extract_strided_slice %40 {offsets = [0, 384], sizes = [2, 128], strides = [1, 1]} : vector<2x512xf32> to vector<2x128xf32>
    %48 = math.tanh %47 : vector<2x128xf32>
    %49 = vector.extract_strided_slice %46 {offsets = [0, 0], sizes = [2, 128], strides = [1, 1]} : vector<2x384xf32> to vector<2x128xf32>
    %50 = vector.extract_strided_slice %46 {offsets = [0, 128], sizes = [2, 128], strides = [1, 1]} : vector<2x384xf32> to vector<2x128xf32>
    %51 = vector.extract_strided_slice %46 {offsets = [0, 256], sizes = [2, 128], strides = [1, 1]} : vector<2x384xf32> to vector<2x128xf32>
    %52 = arith.mulf %50, %26 : vector<2x128xf32>
    %53 = arith.mulf %49, %48 : vector<2x128xf32>
    %54 = arith.addf %52, %53 : vector<2x128xf32>
    %55 = math.tanh %54 : vector<2x128xf32>
    %56 = arith.mulf %51, %55 : vector<2x128xf32>
    %57 = arith.truncf %56 : vector<2x128xf32> to vector<2x128xbf16>
    %58 = arith.index_cast %c1_i32 : i32 to index
    %c0_16 = arith.constant 0 : index
    %c0_17 = arith.constant 0 : index
    %59 = vector.load %arg4[%58, %c0_16, %c0_17] : memref<9x2x128xbf16, #tpu.memory_space<vmem>>, vector<1x2x128xbf16>
    %60 = vector.shape_cast %59 : vector<1x2x128xbf16> to vector<2x128xbf16>
    %61 = vector.shape_cast %57 : vector<2x128xbf16> to vector<1x2x128xbf16>
    tpu.vector_store %arg4[%58, %c0_16, %c0_17], %61 {strides = array<i32>} : memref<9x2x128xbf16, #tpu.memory_space<vmem>>, vector<1x2x128xbf16>,
    %c2_i32 = arith.constant 2 : i32
    %62 = arith.truncf %56 : vector<2x128xf32> to vector<2x128xbf16>
    %cst_18 = arith.constant dense<0.000000e+00> : vector<2x512xf32>
    %63 = tpu.matmul %62, %3, %cst_18 {dimension_numbers = #tpu.dot_dimension_numbers<[1], [0], [0], [1], [0, 0, 1, 1], [], []>} : vector<2x128xbf16>, vector<128x512xbf16>, vector<2x512xf32> -> vector<2x512xf32>
    %64 = arith.index_cast %c2_i32 : i32 to index
    %c0_19 = arith.constant 0 : index
    %c0_20 = arith.constant 0 : index
    %65 = vector.load %arg2[%64, %c0_19, %c0_20] : memref<9x2x512xbf16, #tpu.memory_space<vmem>>, vector<1x2x512xbf16>
    %66 = vector.shape_cast %65 : vector<1x2x512xbf16> to vector<2x512xbf16>
    %67 = arith.extf %66 : vector<2x512xbf16> to vector<2x512xf32>
    %68 = arith.addf %63, %67 : vector<2x512xf32>
    %69 = vector.extract_strided_slice %68 {offsets = [0, 0], sizes = [2, 384], strides = [1, 1]} : vector<2x512xf32> to vector<2x384xf32>
    %70 = arith.negf %69 : vector<2x384xf32>
    %71 = math.exp %70 : vector<2x384xf32>
    %cst_21 = arith.constant 1.000000e+00 : f32
    %72 = vector.broadcast %cst_21 : f32 to vector<2x384xf32>
    %73 = arith.addf %72, %71 : vector<2x384xf32>
    %74 = arith.divf %72, %73 : vector<2x384xf32>
    %75 = vector.extract_strided_slice %68 {offsets = [0, 384], sizes = [2, 128], strides = [1, 1]} : vector<2x512xf32> to vector<2x128xf32>
    %76 = math.tanh %75 : vector<2x128xf32>
    %77 = vector.extract_strided_slice %74 {offsets = [0, 0], sizes = [2, 128], strides = [1, 1]} : vector<2x384xf32> to vector<2x128xf32>
    %78 = vector.extract_strided_slice %74 {offsets = [0, 128], sizes = [2, 128], strides = [1, 1]} : vector<2x384xf32> to vector<2x128xf32>
    %79 = vector.extract_strided_slice %74 {offsets = [0, 256], sizes = [2, 128], strides = [1, 1]} : vector<2x384xf32> to vector<2x128xf32>
    %80 = arith.mulf %78, %54 : vector<2x128xf32>
    %81 = arith.mulf %77, %76 : vector<2x128xf32>
    %82 = arith.addf %80, %81 : vector<2x128xf32>
    %83 = math.tanh %82 : vector<2x128xf32>
    %84 = arith.mulf %79, %83 : vector<2x128xf32>
    %85 = arith.truncf %84 : vector<2x128xf32> to vector<2x128xbf16>
    %86 = arith.index_cast %c2_i32 : i32 to index
    %c0_22 = arith.constant 0 : index
    %c0_23 = arith.constant 0 : index
    %87 = vector.load %arg4[%86, %c0_22, %c0_23] : memref<9x2x128xbf16, #tpu.memory_space<vmem>>, vector<1x2x128xbf16>
    %88 = vector.shape_cast %87 : vector<1x2x128xbf16> to vector<2x128xbf16>
    %89 = vector.shape_cast %85 : vector<2x128xbf16> to vector<1x2x128xbf16>
    tpu.vector_store %arg4[%86, %c0_22, %c0_23], %89 {strides = array<i32>} : memref<9x2x128xbf16, #tpu.memory_space<vmem>>, vector<1x2x128xbf16>,
    %c3_i32 = arith.constant 3 : i32
    %90 = arith.truncf %84 : vector<2x128xf32> to vector<2x128xbf16>
    %cst_24 = arith.constant dense<0.000000e+00> : vector<2x512xf32>
    %91 = tpu.matmul %90, %3, %cst_24 {dimension_numbers = #tpu.dot_dimension_numbers<[1], [0], [0], [1], [0, 0, 1, 1], [], []>} : vector<2x128xbf16>, vector<128x512xbf16>, vector<2x512xf32> -> vector<2x512xf32>
    %92 = arith.index_cast %c3_i32 : i32 to index
    %c0_25 = arith.constant 0 : index
    %c0_26 = arith.constant 0 : index
    %93 = vector.load %arg2[%92, %c0_25, %c0_26] : memref<9x2x512xbf16, #tpu.memory_space<vmem>>, vector<1x2x512xbf16>
    %94 = vector.shape_cast %93 : vector<1x2x512xbf16> to vector<2x512xbf16>
    %95 = arith.extf %94 : vector<2x512xbf16> to vector<2x512xf32>
    %96 = arith.addf %91, %95 : vector<2x512xf32>
    %97 = vector.extract_strided_slice %96 {offsets = [0, 0], sizes = [2, 384], strides = [1, 1]} : vector<2x512xf32> to vector<2x384xf32>
    %98 = arith.negf %97 : vector<2x384xf32>
    %99 = math.exp %98 : vector<2x384xf32>
    %cst_27 = arith.constant 1.000000e+00 : f32
    %100 = vector.broadcast %cst_27 : f32 to vector<2x384xf32>
    %101 = arith.addf %100, %99 : vector<2x384xf32>
    %102 = arith.divf %100, %101 : vector<2x384xf32>
    %103 = vector.extract_strided_slice %96 {offsets = [0, 384], sizes = [2, 128], strides = [1, 1]} : vector<2x512xf32> to vector<2x128xf32>
    %104 = math.tanh %103 : vector<2x128xf32>
    %105 = vector.extract_strided_slice %102 {offsets = [0, 0], sizes = [2, 128], strides = [1, 1]} : vector<2x384xf32> to vector<2x128xf32>
    %106 = vector.extract_strided_slice %102 {offsets = [0, 128], sizes = [2, 128], strides = [1, 1]} : vector<2x384xf32> to vector<2x128xf32>
    %107 = vector.extract_strided_slice %102 {offsets = [0, 256], sizes = [2, 128], strides = [1, 1]} : vector<2x384xf32> to vector<2x128xf32>
    %108 = arith.mulf %106, %82 : vector<2x128xf32>
    %109 = arith.mulf %105, %104 : vector<2x128xf32>
    %110 = arith.addf %108, %109 : vector<2x128xf32>
    %111 = math.tanh %110 : vector<2x128xf32>
    %112 = arith.mulf %107, %111 : vector<2x128xf32>
    %113 = arith.truncf %112 : vector<2x128xf32> to vector<2x128xbf16>
    %114 = arith.index_cast %c3_i32 : i32 to index
    %c0_28 = arith.constant 0 : index
    %c0_29 = arith.constant 0 : index
    %115 = vector.load %arg4[%114, %c0_28, %c0_29] : memref<9x2x128xbf16, #tpu.memory_space<vmem>>, vector<1x2x128xbf16>
    %116 = vector.shape_cast %115 : vector<1x2x128xbf16> to vector<2x128xbf16>
    %117 = vector.shape_cast %113 : vector<2x128xbf16> to vector<1x2x128xbf16>
    tpu.vector_store %arg4[%114, %c0_28, %c0_29], %117 {strides = array<i32>} : memref<9x2x128xbf16, #tpu.memory_space<vmem>>, vector<1x2x128xbf16>,
    %c4_i32 = arith.constant 4 : i32
    %118 = arith.truncf %112 : vector<2x128xf32> to vector<2x128xbf16>
    %cst_30 = arith.constant dense<0.000000e+00> : vector<2x512xf32>
    %119 = tpu.matmul %118, %3, %cst_30 {dimension_numbers = #tpu.dot_dimension_numbers<[1], [0], [0], [1], [0, 0, 1, 1], [], []>} : vector<2x128xbf16>, vector<128x512xbf16>, vector<2x512xf32> -> vector<2x512xf32>
    %120 = arith.index_cast %c4_i32 : i32 to index
    %c0_31 = arith.constant 0 : index
    %c0_32 = arith.constant 0 : index
    %121 = vector.load %arg2[%120, %c0_31, %c0_32] : memref<9x2x512xbf16, #tpu.memory_space<vmem>>, vector<1x2x512xbf16>
    %122 = vector.shape_cast %121 : vector<1x2x512xbf16> to vector<2x512xbf16>
    %123 = arith.extf %122 : vector<2x512xbf16> to vector<2x512xf32>
    %124 = arith.addf %119, %123 : vector<2x512xf32>
    %125 = vector.extract_strided_slice %124 {offsets = [0, 0], sizes = [2, 384], strides = [1, 1]} : vector<2x512xf32> to vector<2x384xf32>
    %126 = arith.negf %125 : vector<2x384xf32>
    %127 = math.exp %126 : vector<2x384xf32>
    %cst_33 = arith.constant 1.000000e+00 : f32
    %128 = vector.broadcast %cst_33 : f32 to vector<2x384xf32>
    %129 = arith.addf %128, %127 : vector<2x384xf32>
    %130 = arith.divf %128, %129 : vector<2x384xf32>
    %131 = vector.extract_strided_slice %124 {offsets = [0, 384], sizes = [2, 128], strides = [1, 1]} : vector<2x512xf32> to vector<2x128xf32>
    %132 = math.tanh %131 : vector<2x128xf32>
    %133 = vector.extract_strided_slice %130 {offsets = [0, 0], sizes = [2, 128], strides = [1, 1]} : vector<2x384xf32> to vector<2x128xf32>
    %134 = vector.extract_strided_slice %130 {offsets = [0, 128], sizes = [2, 128], strides = [1, 1]} : vector<2x384xf32> to vector<2x128xf32>
    %135 = vector.extract_strided_slice %130 {offsets = [0, 256], sizes = [2, 128], strides = [1, 1]} : vector<2x384xf32> to vector<2x128xf32>
    %136 = arith.mulf %134, %110 : vector<2x128xf32>
    %137 = arith.mulf %133, %132 : vector<2x128xf32>
    %138 = arith.addf %136, %137 : vector<2x128xf32>
    %139 = math.tanh %138 : vector<2x128xf32>
    %140 = arith.mulf %135, %139 : vector<2x128xf32>
    %141 = arith.truncf %140 : vector<2x128xf32> to vector<2x128xbf16>
    %142 = arith.index_cast %c4_i32 : i32 to index
    %c0_34 = arith.constant 0 : index
    %c0_35 = arith.constant 0 : index
    %143 = vector.load %arg4[%142, %c0_34, %c0_35] : memref<9x2x128xbf16, #tpu.memory_space<vmem>>, vector<1x2x128xbf16>
    %144 = vector.shape_cast %143 : vector<1x2x128xbf16> to vector<2x128xbf16>
    %145 = vector.shape_cast %141 : vector<2x128xbf16> to vector<1x2x128xbf16>
    tpu.vector_store %arg4[%142, %c0_34, %c0_35], %145 {strides = array<i32>} : memref<9x2x128xbf16, #tpu.memory_space<vmem>>, vector<1x2x128xbf16>,
    %c5_i32 = arith.constant 5 : i32
    %146 = arith.truncf %140 : vector<2x128xf32> to vector<2x128xbf16>
    %cst_36 = arith.constant dense<0.000000e+00> : vector<2x512xf32>
    %147 = tpu.matmul %146, %3, %cst_36 {dimension_numbers = #tpu.dot_dimension_numbers<[1], [0], [0], [1], [0, 0, 1, 1], [], []>} : vector<2x128xbf16>, vector<128x512xbf16>, vector<2x512xf32> -> vector<2x512xf32>
    %148 = arith.index_cast %c5_i32 : i32 to index
    %c0_37 = arith.constant 0 : index
    %c0_38 = arith.constant 0 : index
    %149 = vector.load %arg2[%148, %c0_37, %c0_38] : memref<9x2x512xbf16, #tpu.memory_space<vmem>>, vector<1x2x512xbf16>
    %150 = vector.shape_cast %149 : vector<1x2x512xbf16> to vector<2x512xbf16>
    %151 = arith.extf %150 : vector<2x512xbf16> to vector<2x512xf32>
    %152 = arith.addf %147, %151 : vector<2x512xf32>
    %153 = vector.extract_strided_slice %152 {offsets = [0, 0], sizes = [2, 384], strides = [1, 1]} : vector<2x512xf32> to vector<2x384xf32>
    %154 = arith.negf %153 : vector<2x384xf32>
    %155 = math.exp %154 : vector<2x384xf32>
    %cst_39 = arith.constant 1.000000e+00 : f32
    %156 = vector.broadcast %cst_39 : f32 to vector<2x384xf32>
    %157 = arith.addf %156, %155 : vector<2x384xf32>
    %158 = arith.divf %156, %157 : vector<2x384xf32>
    %159 = vector.extract_strided_slice %152 {offsets = [0, 384], sizes = [2, 128], strides = [1, 1]} : vector<2x512xf32> to vector<2x128xf32>
    %160 = math.tanh %159 : vector<2x128xf32>
    %161 = vector.extract_strided_slice %158 {offsets = [0, 0], sizes = [2, 128], strides = [1, 1]} : vector<2x384xf32> to vector<2x128xf32>
    %162 = vector.extract_strided_slice %158 {offsets = [0, 128], sizes = [2, 128], strides = [1, 1]} : vector<2x384xf32> to vector<2x128xf32>
    %163 = vector.extract_strided_slice %158 {offsets = [0, 256], sizes = [2, 128], strides = [1, 1]} : vector<2x384xf32> to vector<2x128xf32>
    %164 = arith.mulf %162, %138 : vector<2x128xf32>
    %165 = arith.mulf %161, %160 : vector<2x128xf32>
    %166 = arith.addf %164, %165 : vector<2x128xf32>
    %167 = math.tanh %166 : vector<2x128xf32>
    %168 = arith.mulf %163, %167 : vector<2x128xf32>
    %169 = arith.truncf %168 : vector<2x128xf32> to vector<2x128xbf16>
    %170 = arith.index_cast %c5_i32 : i32 to index
    %c0_40 = arith.constant 0 : index
    %c0_41 = arith.constant 0 : index
    %171 = vector.load %arg4[%170, %c0_40, %c0_41] : memref<9x2x128xbf16, #tpu.memory_space<vmem>>, vector<1x2x128xbf16>
    %172 = vector.shape_cast %171 : vector<1x2x128xbf16> to vector<2x128xbf16>
    %173 = vector.shape_cast %169 : vector<2x128xbf16> to vector<1x2x128xbf16>
    tpu.vector_store %arg4[%170, %c0_40, %c0_41], %173 {strides = array<i32>} : memref<9x2x128xbf16, #tpu.memory_space<vmem>>, vector<1x2x128xbf16>,
    %c6_i32 = arith.constant 6 : i32
    %174 = arith.truncf %168 : vector<2x128xf32> to vector<2x128xbf16>
    %cst_42 = arith.constant dense<0.000000e+00> : vector<2x512xf32>
    %175 = tpu.matmul %174, %3, %cst_42 {dimension_numbers = #tpu.dot_dimension_numbers<[1], [0], [0], [1], [0, 0, 1, 1], [], []>} : vector<2x128xbf16>, vector<128x512xbf16>, vector<2x512xf32> -> vector<2x512xf32>
    %176 = arith.index_cast %c6_i32 : i32 to index
    %c0_43 = arith.constant 0 : index
    %c0_44 = arith.constant 0 : index
    %177 = vector.load %arg2[%176, %c0_43, %c0_44] : memref<9x2x512xbf16, #tpu.memory_space<vmem>>, vector<1x2x512xbf16>
    %178 = vector.shape_cast %177 : vector<1x2x512xbf16> to vector<2x512xbf16>
    %179 = arith.extf %178 : vector<2x512xbf16> to vector<2x512xf32>
    %180 = arith.addf %175, %179 : vector<2x512xf32>
    %181 = vector.extract_strided_slice %180 {offsets = [0, 0], sizes = [2, 384], strides = [1, 1]} : vector<2x512xf32> to vector<2x384xf32>
    %182 = arith.negf %181 : vector<2x384xf32>
    %183 = math.exp %182 : vector<2x384xf32>
    %cst_45 = arith.constant 1.000000e+00 : f32
    %184 = vector.broadcast %cst_45 : f32 to vector<2x384xf32>
    %185 = arith.addf %184, %183 : vector<2x384xf32>
    %186 = arith.divf %184, %185 : vector<2x384xf32>
    %187 = vector.extract_strided_slice %180 {offsets = [0, 384], sizes = [2, 128], strides = [1, 1]} : vector<2x512xf32> to vector<2x128xf32>
    %188 = math.tanh %187 : vector<2x128xf32>
    %189 = vector.extract_strided_slice %186 {offsets = [0, 0], sizes = [2, 128], strides = [1, 1]} : vector<2x384xf32> to vector<2x128xf32>
    %190 = vector.extract_strided_slice %186 {offsets = [0, 128], sizes = [2, 128], strides = [1, 1]} : vector<2x384xf32> to vector<2x128xf32>
    %191 = vector.extract_strided_slice %186 {offsets = [0, 256], sizes = [2, 128], strides = [1, 1]} : vector<2x384xf32> to vector<2x128xf32>
    %192 = arith.mulf %190, %166 : vector<2x128xf32>
    %193 = arith.mulf %189, %188 : vector<2x128xf32>
    %194 = arith.addf %192, %193 : vector<2x128xf32>
    %195 = math.tanh %194 : vector<2x128xf32>
    %196 = arith.mulf %191, %195 : vector<2x128xf32>
    %197 = arith.truncf %196 : vector<2x128xf32> to vector<2x128xbf16>
    %198 = arith.index_cast %c6_i32 : i32 to index
    %c0_46 = arith.constant 0 : index
    %c0_47 = arith.constant 0 : index
    %199 = vector.load %arg4[%198, %c0_46, %c0_47] : memref<9x2x128xbf16, #tpu.memory_space<vmem>>, vector<1x2x128xbf16>
    %200 = vector.shape_cast %199 : vector<1x2x128xbf16> to vector<2x128xbf16>
    %201 = vector.shape_cast %197 : vector<2x128xbf16> to vector<1x2x128xbf16>
    tpu.vector_store %arg4[%198, %c0_46, %c0_47], %201 {strides = array<i32>} : memref<9x2x128xbf16, #tpu.memory_space<vmem>>, vector<1x2x128xbf16>,
    %c7_i32 = arith.constant 7 : i32
    %202 = arith.truncf %196 : vector<2x128xf32> to vector<2x128xbf16>
    %cst_48 = arith.constant dense<0.000000e+00> : vector<2x512xf32>
    %203 = tpu.matmul %202, %3, %cst_48 {dimension_numbers = #tpu.dot_dimension_numbers<[1], [0], [0], [1], [0, 0, 1, 1], [], []>} : vector<2x128xbf16>, vector<128x512xbf16>, vector<2x512xf32> -> vector<2x512xf32>
    %204 = arith.index_cast %c7_i32 : i32 to index
    %c0_49 = arith.constant 0 : index
    %c0_50 = arith.constant 0 : index
    %205 = vector.load %arg2[%204, %c0_49, %c0_50] : memref<9x2x512xbf16, #tpu.memory_space<vmem>>, vector<1x2x512xbf16>
    %206 = vector.shape_cast %205 : vector<1x2x512xbf16> to vector<2x512xbf16>
    %207 = arith.extf %206 : vector<2x512xbf16> to vector<2x512xf32>
    %208 = arith.addf %203, %207 : vector<2x512xf32>
    %209 = vector.extract_strided_slice %208 {offsets = [0, 0], sizes = [2, 384], strides = [1, 1]} : vector<2x512xf32> to vector<2x384xf32>
    %210 = arith.negf %209 : vector<2x384xf32>
    %211 = math.exp %210 : vector<2x384xf32>
    %cst_51 = arith.constant 1.000000e+00 : f32
    %212 = vector.broadcast %cst_51 : f32 to vector<2x384xf32>
    %213 = arith.addf %212, %211 : vector<2x384xf32>
    %214 = arith.divf %212, %213 : vector<2x384xf32>
    %215 = vector.extract_strided_slice %208 {offsets = [0, 384], sizes = [2, 128], strides = [1, 1]} : vector<2x512xf32> to vector<2x128xf32>
    %216 = math.tanh %215 : vector<2x128xf32>
    %217 = vector.extract_strided_slice %214 {offsets = [0, 0], sizes = [2, 128], strides = [1, 1]} : vector<2x384xf32> to vector<2x128xf32>
    %218 = vector.extract_strided_slice %214 {offsets = [0, 128], sizes = [2, 128], strides = [1, 1]} : vector<2x384xf32> to vector<2x128xf32>
    %219 = vector.extract_strided_slice %214 {offsets = [0, 256], sizes = [2, 128], strides = [1, 1]} : vector<2x384xf32> to vector<2x128xf32>
    %220 = arith.mulf %218, %194 : vector<2x128xf32>
    %221 = arith.mulf %217, %216 : vector<2x128xf32>
    %222 = arith.addf %220, %221 : vector<2x128xf32>
    %223 = math.tanh %222 : vector<2x128xf32>
    %224 = arith.mulf %219, %223 : vector<2x128xf32>
    %225 = arith.truncf %224 : vector<2x128xf32> to vector<2x128xbf16>
    %226 = arith.index_cast %c7_i32 : i32 to index
    %c0_52 = arith.constant 0 : index
    %c0_53 = arith.constant 0 : index
    %227 = vector.load %arg4[%226, %c0_52, %c0_53] : memref<9x2x128xbf16, #tpu.memory_space<vmem>>, vector<1x2x128xbf16>
    %228 = vector.shape_cast %227 : vector<1x2x128xbf16> to vector<2x128xbf16>
    %229 = vector.shape_cast %225 : vector<2x128xbf16> to vector<1x2x128xbf16>
    tpu.vector_store %arg4[%226, %c0_52, %c0_53], %229 {strides = array<i32>} : memref<9x2x128xbf16, #tpu.memory_space<vmem>>, vector<1x2x128xbf16>,
    %c8_i32 = arith.constant 8 : i32
    %230 = arith.truncf %224 : vector<2x128xf32> to vector<2x128xbf16>
    %cst_54 = arith.constant dense<0.000000e+00> : vector<2x512xf32>
    %231 = tpu.matmul %230, %3, %cst_54 {dimension_numbers = #tpu.dot_dimension_numbers<[1], [0], [0], [1], [0, 0, 1, 1], [], []>} : vector<2x128xbf16>, vector<128x512xbf16>, vector<2x512xf32> -> vector<2x512xf32>
    %232 = arith.index_cast %c8_i32 : i32 to index
    %c0_55 = arith.constant 0 : index
    %c0_56 = arith.constant 0 : index
    %233 = vector.load %arg2[%232, %c0_55, %c0_56] : memref<9x2x512xbf16, #tpu.memory_space<vmem>>, vector<1x2x512xbf16>
    %234 = vector.shape_cast %233 : vector<1x2x512xbf16> to vector<2x512xbf16>
    %235 = arith.extf %234 : vector<2x512xbf16> to vector<2x512xf32>
    %236 = arith.addf %231, %235 : vector<2x512xf32>
    %237 = vector.extract_strided_slice %236 {offsets = [0, 0], sizes = [2, 384], strides = [1, 1]} : vector<2x512xf32> to vector<2x384xf32>
    %238 = arith.negf %237 : vector<2x384xf32>
    %239 = math.exp %238 : vector<2x384xf32>
    %cst_57 = arith.constant 1.000000e+00 : f32
    %240 = vector.broadcast %cst_57 : f32 to vector<2x384xf32>
    %241 = arith.addf %240, %239 : vector<2x384xf32>
    %242 = arith.divf %240, %241 : vector<2x384xf32>
    %243 = vector.extract_strided_slice %236 {offsets = [0, 384], sizes = [2, 128], strides = [1, 1]} : vector<2x512xf32> to vector<2x128xf32>
    %244 = math.tanh %243 : vector<2x128xf32>
    %245 = vector.extract_strided_slice %242 {offsets = [0, 0], sizes = [2, 128], strides = [1, 1]} : vector<2x384xf32> to vector<2x128xf32>
    %246 = vector.extract_strided_slice %242 {offsets = [0, 128], sizes = [2, 128], strides = [1, 1]} : vector<2x384xf32> to vector<2x128xf32>
    %247 = vector.extract_strided_slice %242 {offsets = [0, 256], sizes = [2, 128], strides = [1, 1]} : vector<2x384xf32> to vector<2x128xf32>
    %248 = arith.mulf %246, %222 : vector<2x128xf32>
    %249 = arith.mulf %245, %244 : vector<2x128xf32>
    %250 = arith.addf %248, %249 : vector<2x128xf32>
    %251 = math.tanh %250 : vector<2x128xf32>
    %252 = arith.mulf %247, %251 : vector<2x128xf32>
    %253 = arith.truncf %252 : vector<2x128xf32> to vector<2x128xbf16>
    %254 = arith.index_cast %c8_i32 : i32 to index
    %c0_58 = arith.constant 0 : index
    %c0_59 = arith.constant 0 : index
    %255 = vector.load %arg4[%254, %c0_58, %c0_59] : memref<9x2x128xbf16, #tpu.memory_space<vmem>>, vector<1x2x128xbf16>
    %256 = vector.shape_cast %255 : vector<1x2x128xbf16> to vector<2x128xbf16>
    %257 = vector.shape_cast %253 : vector<2x128xbf16> to vector<1x2x128xbf16>
    tpu.vector_store %arg4[%254, %c0_58, %c0_59], %257 {strides = array<i32>} : memref<9x2x128xbf16, #tpu.memory_space<vmem>>, vector<1x2x128xbf16>,
    %c9_i32 = arith.constant 9 : i32
    %c0_60 = arith.constant 0 : index
    %c0_61 = arith.constant 0 : index
    %258 = vector.load %arg5[%c0_60, %c0_61] : memref<2x128xf32, #tpu.memory_space<vmem>>, vector<2x128xf32>
    tpu.vector_store %arg5[%c0_60, %c0_61], %252 {strides = array<i32>} : memref<2x128xf32, #tpu.memory_space<vmem>>, vector<2x128xf32>,
    %c0_62 = arith.constant 0 : index
    %c0_63 = arith.constant 0 : index
    %259 = vector.load %arg6[%c0_62, %c0_63] : memref<2x128xf32, #tpu.memory_space<vmem>>, vector<2x128xf32>
    tpu.vector_store %arg6[%c0_62, %c0_63], %250 {strides = array<i32>} : memref<2x128xf32, #tpu.memory_space<vmem>>, vector<2x128xf32>,
    return
  }
  func.func @transform_0(%arg0: i32, %arg1: i32) -> (i32, i32, i32) {
    %c0_i32 = arith.constant 0 : i32
    %c0_i32_0 = arith.constant 0 : i32
    return %arg1, %arg0, %c0_i32 : i32, i32, i32
  }
  func.func @transform_1(%arg0: i32, %arg1: i32) -> (i32, i32) {
    %c0_i32 = arith.constant 0 : i32
    %c0_i32_0 = arith.constant 0 : i32
    %c0_i32_1 = arith.constant 0 : i32
    return %c0_i32, %c0_i32_0 : i32, i32
  }
  func.func @transform_2(%arg0: i32, %arg1: i32) -> (i32, i32, i32) {
    %c0_i32 = arith.constant 0 : i32
    %c0_i32_0 = arith.constant 0 : i32
    return %arg1, %arg0, %c0_i32 : i32, i32, i32
  }
}

module attributes {stable_mosaic.version = 11 : i64} {
  func.func @_matmul_bias_kernel(%arg0: i32, %arg1: i32, %arg2: memref<18x128xbf16, #tpu.memory_space<vmem>>, %arg3: memref<128x128xbf16, #tpu.memory_space<vmem>>, %arg4: memref<1x128xf32, #tpu.memory_space<vmem>>, %arg5: memref<18x128xf32, #tpu.memory_space<vmem>>) attributes {dimension_semantics = [#tpu.dimension_semantics<parallel>, #tpu.dimension_semantics<parallel>], iteration_bounds = array<i64: 1, 1>, scalar_prefetch = 0 : i64, scratch_operands = 0 : i64, tpu.core_type = #tpu.core_type<tc>, window_params = [{transform_indices = @transform_0, window_bounds = array<i64: 18, 128>}, {transform_indices = @transform_1, window_bounds = array<i64: 128, 128>}, {transform_indices = @transform_2, window_bounds = array<i64: 1, 128>}, {transform_indices = @transform_3, window_bounds = array<i64: 18, 128>}]} {
    %c0 = arith.constant 0 : index
    %c0_0 = arith.constant 0 : index
    %0 = vector.load %arg2[%c0, %c0_0] : memref<18x128xbf16, #tpu.memory_space<vmem>>, vector<18x128xbf16>
    %c0_1 = arith.constant 0 : index
    %c0_2 = arith.constant 0 : index
    %1 = vector.load %arg3[%c0_1, %c0_2] : memref<128x128xbf16, #tpu.memory_space<vmem>>, vector<128x128xbf16>
    %cst = arith.constant dense<0.000000e+00> : vector<18x128xf32>
    %2 = tpu.matmul %0, %1, %cst {dimension_numbers = #tpu.dot_dimension_numbers<[1], [0], [0], [1], [0, 0, 1, 1], [], []>} : vector<18x128xbf16>, vector<128x128xbf16>, vector<18x128xf32> -> vector<18x128xf32>
    %c0_3 = arith.constant 0 : index
    %c0_4 = arith.constant 0 : index
    %3 = vector.load %arg4[%c0_3, %c0_4] : memref<1x128xf32, #tpu.memory_space<vmem>>, vector<1x128xf32>
    %4 = vector.broadcast %3 : vector<1x128xf32> to vector<18x128xf32>
    %5 = arith.addf %2, %4 : vector<18x128xf32>
    %c0_5 = arith.constant 0 : index
    %c0_6 = arith.constant 0 : index
    %6 = vector.load %arg5[%c0_5, %c0_6] : memref<18x128xf32, #tpu.memory_space<vmem>>, vector<18x128xf32>
    tpu.vector_store %arg5[%c0_5, %c0_6], %5 {strides = array<i32>} : memref<18x128xf32, #tpu.memory_space<vmem>>, vector<18x128xf32>,
    return
  }
  func.func @transform_0(%arg0: i32, %arg1: i32) -> (i32, i32) {
    %c0_i32 = arith.constant 0 : i32
    %c0_i32_0 = arith.constant 0 : i32
    return %arg0, %c0_i32 : i32, i32
  }
  func.func @transform_1(%arg0: i32, %arg1: i32) -> (i32, i32) {
    %c0_i32 = arith.constant 0 : i32
    %c0_i32_0 = arith.constant 0 : i32
    return %c0_i32, %arg1 : i32, i32
  }
  func.func @transform_2(%arg0: i32, %arg1: i32) -> (i32, i32) {
    %c0_i32 = arith.constant 0 : i32
    %c0_i32_0 = arith.constant 0 : i32
    return %c0_i32, %arg1 : i32, i32
  }
  func.func @transform_3(%arg0: i32, %arg1: i32) -> (i32, i32) {
    %c0_i32 = arith.constant 0 : i32
    return %arg0, %arg1 : i32, i32
  }
}

</mosaic_0001>

<bundles_post_ra>
// kernel: decoder_rnn_forward.5
= control target key start
LH: loop header
LB: loop body
LE: loop exit
PB: predicated region body
PF: predicated region fallthrough
CT: control target
= control target key end

     0   :  { %s267_s1 = inlined_call_operand.vmem [shape: bf16[128,128], index: 1, kind: input, shape index: {}]   ;;  %s268_s0 = inlined_call_operand.vmem [shape: bf16[18,128], index: 0, kind: input, shape index: {}]   ;;  %s269_s2 = inlined_call_operand.vmem [shape: f32[1,128], index: 2, kind: input, shape index: {}]   ;;  %s270_s3 = inlined_call_operand.vmem [shape: f32[18,128], index: 3, kind: output, shape index: {}]  }
   0x1   :  { %v195_v0 = vld [vmem:[%s267_s1 + $0x38] sm:$0xff]   ;;  %v196_v1 = vld [vmem:[%s267_s1 + $0x30] sm:$0xff]   ;;  %v197_v2 = vld [vmem:[%s267_s1 + $0x28] sm:$0xff]  }
   0x2   :  { %175 = vmatprep.subr.bf16.mxu0 %v195_v0  ;;  %v198_v3 = vld [vmem:[%s267_s1 + $0x20] sm:$0xff]   ;;  %v199_v5 = vld [vmem:[%s267_s1 + $0x18] sm:$0xff]   ;;  %v200_v6 = vld [vmem:[%s267_s1 + $0x10] sm:$0xff]  }
   0x3   :  { %176 = vmatpush3.bf16.msra.mxu0 %v195_v0  ;;  %v203_v4 = vld [vmem:[%s268_s0] sm:$0xff]   ;;  %v201_v7 = vld [vmem:[%s267_s1 + $0x8] sm:$0xff]  }
   0x4   :  { %177 = vmatprep.subr.bf16.mxu0 %v196_v1  ;;  %191 = vmatprep.mubr.bf16.mxu0 %v203_v4  ;;  %v202_v8 = vld [vmem:[%s267_s1] sm:$0xff]   ;;  %v204_v9 = vld [vmem:[%s268_s0 + $0x8] ss:$0 sps:$4 sm:$0x11]  }
   0x5   :  { %v154_v10 = vld [vmem:[%s269_s2] ss:$0 sm:$0xff] }
   0x7   :  { %178 = vmatpush3.bf16.msra.mxu0 %v196_v1 }
   0x8   :  { %179 = vmatprep.subr.bf16.mxu0 %v197_v2 }
   0xb   :  { %180 = vmatpush3.bf16.msra.mxu0 %v197_v2 }
   0xc   :  { %181 = vmatprep.subr.bf16.mxu0 %v198_v3 }
   0xf   :  { %182 = vmatpush3.bf16.msra.mxu0 %v198_v3 }
  0x10   :  { %183 = vmatprep.subr.bf16.mxu0 %v199_v5 }
  0x13   :  { %184 = vmatpush3.bf16.msra.mxu0 %v199_v5 }
  0x14   :  { %185 = vmatprep.subr.bf16.mxu0 %v200_v6 }
  0x17   :  { %186 = vmatpush3.bf16.msra.mxu0 %v200_v6 }
  0x18   :  { %187 = vmatprep.subr.bf16.mxu0 %v201_v7 }
  0x1b   :  { %188 = vmatpush3.bf16.msra.mxu0 %v201_v7 }
  0x1c   :  { %189 = vmatprep.subr.bf16.mxu0 %v202_v8 }
  0x1f   :  { %190 = vmatpush3.bf16.msra.mxu0 %v202_v8 }
  0x22   :  { %192 = vmatmul.mubr.bf16.vlgmr.msra.gmra.mxu0 %v204_v9 }
  0xe2   :  { %v193_v11 = vpop.f32.mrf.mxu0 }
  0xe3   :  { %v142_v12 = vadd.f32 %v193_v11, %v154_v10 }
  0xe4   :  { %v133_v13 = vpop.f32.mrf.mxu0 }
  0xe5   :  { %149 = vst [vmem:[%s270_s3 + $0x10] sm:$0x3] %v142_v12  ;;  %v134_v14 = vadd.f32 %v154_v10, %v133_v13 }
  0xe6   :  { %v194_v15 = vpop.f32.mrf.mxu0 }
  0xe7   :  { %147 = vst [vmem:[%s270_s3] sm:$0xff] %v134_v14 }
  0xe8   :  { %v136_v16 = vpop.f32.mrf.mxu0 }
  0xe9   :  { %v137_v17 = vadd.f32 %v154_v10, %v136_v16 }
  0xeb   :  { %148 = vst [vmem:[%s270_s3 + $0x8] sm:$0xff] %v137_v17 }

// kernel: decoder_rnn_forward.3
= control target key start
LH: loop header
LB: loop body
LE: loop exit
PB: predicated region body
PF: predicated region fallthrough
CT: control target
= control target key end

     0   :  { %v296_v1 = vmov 0   ;;  %vm96_vm0 = vcmask 261120   ;;  %v28_v11 = vlaneseq  ;;  %s368_s1 = inlined_call_operand.vmem [shape: bf16[32,512], index: 1, kind: input, shape index: {}]   ;;  %s369_s0 = inlined_call_operand.vmem [shape: bf16[18,32], index: 0, kind: input, shape index: {}]   ;;  %s370_s2 = inlined_call_operand.vmem [shape: f32[1,512], index: 2, kind: input, shape index: {}]   ;;  %s371_s3 = inlined_call_operand.vmem [shape: bf16[18,512], index: 3, kind: output, shape index: {}]  }
   0x1   :  { %v282_v0 = vld [vmem:[%s368_s1 + $0x24] ss:$16 sps:$4 sm:$0xff]   ;;  %135 = vmatprep.mubr.bf16.mxu0 %v296_v1  ;;  %186 = vmatprep.mubr.bf16.mxu1 %v296_v1  ;;  %v284_v2 = vld [vmem:[%s368_s1 + $0x2c] ss:$16 sps:$4 sm:$0xff]   ;;  %v286_v3 = vld [vmem:[%s368_s1 + $0x20] ss:$16 sps:$4 sm:$0xff]  }
   0x2   :  { %115 = vmatprep.subr.bf16.mxu0 %v282_v0  ;;  %v287_v4 = vld [vmem:[%s368_s1 + $0x28] ss:$16 sps:$4 sm:$0xff]   ;;  %166 = vmatprep.subr.bf16.mxu1 %v284_v2  ;;  %v288_v5 = vld [vmem:[%s368_s1 + $0x4] ss:$16 sps:$4 sm:$0xff]   ;;  %v290_v6 = vld [vmem:[%s368_s1 + $0xc] ss:$16 sps:$4 sm:$0xff]  }
   0x3   :  { %116 = vmatpush1.bf16.msra.mxu0 %v286_v3  ;;  %167 = vmatpush1.bf16.msra.mxu1 %v287_v4  ;;  %v292_v7 = vld [vmem:[%s368_s1] ss:$16 sps:$4 sm:$0xff]   ;;  %v293_v8 = vld [vmem:[%s368_s1 + $0x8] ss:$16 sps:$4 sm:$0xff]   ;;  %v29_v12 = vshrl.u32 %v28_v11, 7 }
   0x4   :  { %117 = vmatprep.subr.bf16.mxu0 %v288_v5  ;;  %168 = vmatprep.subr.bf16.mxu1 %v290_v6  ;;  %v294_v9 = vld [vmem:[%s369_s0] sm:$0xff]   ;;  %v295_v10 = vld [vmem:[%s369_s0 + $0x8] ss:$0 sps:$4 sm:$0x11]  }
   0x5   :  { %v30_v13 = vsub.s32 0, %v29_v12  ;;  %v38_v14 = vsub.s32 2, %v29_v12  ;;  %v34_v15 = vsub.s32 1, %v29_v12  ;;  %v42_v16 = vsub.s32 3, %v29_v12  ;;  %v26_v17 = vld [vmem:[%s370_s2] sm:$0xf] }
   0x7   :  { %118 = vmatpush1.bf16.msra.mxu0 %v292_v7  ;;  %169 = vmatpush1.bf16.msra.mxu1 %v293_v8  ;;  %v31_v18 = vrot.slane %v26_v17, %v30_v13  ;;  %v39_v19 = vrot.slane %v26_v17, %v38_v14  ;;  %v35_v20 = vrot.slane %v26_v17, %v34_v15 }
   0x8   :  { %v43_v21 = vrot.slane %v26_v17, %v42_v16 }
   0xa   :  { %265 = vmatmul.mubr.msk.bf16.vlgmr.msra.gmra.mxu0 %vm96_vm0, %v294_v9  ;;  %267 = vmatmul.mubr.msk.bf16.vlgmr.msra.gmra.mxu1 %vm96_vm0, %v294_v9 }
   0xb   :  { %145 = vmatprep.mubr.bf16.mxu0 %v296_v1  ;;  %196 = vmatprep.mubr.bf16.mxu1 %v296_v1 }
  0x12   :  { %266 = vmatmul.mubr.msk.bf16.gmra.mxu0 %vm96_vm0, %v295_v10  ;;  %268 = vmatmul.mubr.msk.bf16.gmra.mxu1 %vm96_vm0, %v295_v10 }
  0xca   :  { %v137_v22 = vpop.f32.mrf.mxu0  ;;  %v188_v23 = vpop.f32.mrf.mxu1 }
  0xcb   :  { %v138_v26 = vadd.f32 %v137_v22, %v31_v18  ;;  %v189_v27 = vadd.f32 %v188_v23, %v39_v19 }
  0xcc   :  { %v139_v24 = vpop.f32.mrf.mxu0  ;;  %v190_v25 = vpop.f32.mrf.mxu1 }
  0xcd   :  { %v140_v28 = vadd.f32 %v139_v24, %v35_v20  ;;  %v191_v29 = vadd.f32 %v190_v25, %v43_v21 }
  0xce   :  { %v141_v30 = vpop.f32.mrf.mxu0  ;;  %v192_v31 = vpop.f32.mrf.mxu1 }
  0xcf   :  { %v275_v32 = vpack.c.bf16 %v140_v28, %v138_v26  ;;  %v276_v33 = vpack.c.bf16 %v191_v29, %v189_v27  ;;  %v142_v36 = vadd.f32 %v141_v30, %v31_v18  ;;  %v193_v37 = vadd.f32 %v192_v31, %v39_v19 }
  0xd0   :  { %v143_v34 = vpop.f32.mrf.mxu0  ;;  %v194_v35 = vpop.f32.mrf.mxu1 }
  0xd1   :  { %245 = vst [vmem:[%s371_s3] sm:$0xff] %v275_v32  ;;  %246 = vst [vmem:[%s371_s3 + $0x8] sm:$0xff] %v276_v33  ;;  %v144_v38 = vadd.f32 %v143_v34, %v35_v20  ;;  %v195_v39 = vadd.f32 %v194_v35, %v43_v21 }
  0xd2   :  { %v147_v40 = vpop.f32.mrf.mxu0  ;;  %v198_v41 = vpop.f32.mrf.mxu1 }
  0xd3   :  { %v277_v42 = vpack.c.bf16 %v144_v38, %v142_v36  ;;  %v278_v43 = vpack.c.bf16 %v195_v39, %v193_v37  ;;  %v148_v46 = vadd.f32 %v147_v40, %v31_v18  ;;  %v199_v47 = vadd.f32 %v198_v41, %v39_v19 }
  0xd4   :  { %v149_v44 = vpop.f32.mrf.mxu0  ;;  %v200_v45 = vpop.f32.mrf.mxu1 }
  0xd5   :  { %247 = vst [vmem:[%s371_s3 + $0x10] sm:$0xff] %v277_v42  ;;  %248 = vst [vmem:[%s371_s3 + $0x18] sm:$0xff] %v278_v43  ;;  %v150_v48 = vadd.f32 %v149_v44, %v35_v20  ;;  %v201_v49 = vadd.f32 %v200_v45, %v43_v21 }
  0xd6   :  { %v151_v50 = vpop.f32.mrf.mxu0  ;;  %v202_v51 = vpop.f32.mrf.mxu1 }
  0xd7   :  { %v279_v52 = vpack.c.bf16 %v150_v48, %v148_v46  ;;  %v280_v53 = vpack.c.bf16 %v201_v49, %v199_v47 }
  0xd8   :  { %v152_v54 = vpop.f32.mrf.mxu0  ;;  %v203_v55 = vpop.f32.mrf.mxu1 }
  0xd9   :  { %249 = vst [vmem:[%s371_s3 + $0x20] sm:$0x11] %v279_v52  ;;  %250 = vst [vmem:[%s371_s3 + $0x28] sm:$0x11] %v280_v53 }

// kernel: decoder_rnn_forward.4
= control target key start
LH: loop header
LB: loop body
LE: loop exit
PB: predicated region body
PF: predicated region fallthrough
CT: control target
= control target key end

     0   :  { %v1725_v1 = vmov 0   ;;  %v1726_v2 = vmov 0.0   ;;  %v1727_v36 = vmov 1983009808   ;;  %v220_v38 = vlaneseq  ;;  %s2471_s1 = inlined_call_operand.vmem [shape: bf16[128,512], index: 1, kind: input, shape index: {}]   ;;  %s2472_s0 = inlined_call_operand.vmem [shape: bf16[9,2,512], index: 0, kind: input, shape index: {}]   ;;  %s2473_s2 = inlined_call_operand.vmem [shape: bf16[9,2,128], index: 2, kind: output, shape index: {}]  }
   0x1   :  { %v1746_v0 = vld [vmem:[%s2471_s1 + $0xe4] ss:$16 sps:$4 sm:$0xff]   ;;  %269 = vmatprep.mubr.bf16.mxu0 %v1725_v1  ;;  %16 = vst [vmem:[#allocation2] sm:$0x3] %v1726_v2  ;;  %17 = vst [vmem:[#allocation3] sm:$0x3] %v1726_v2  ;;  %310 = vmatprep.mubr.bf16.mxu1 %v1725_v1  ;;  %v218_v37 = vunpack.c.l.s4 %v1727_v36 }
   0x2   :  { %v1753_v3 = vld [vmem:[%s2471_s1 + $0xe0] ss:$16 sps:$4 sm:$0xff]   ;;  %237 = vmatprep.subr.bf16.mxu0 %v1746_v0  ;;  %v1759_v4 = vld [vmem:[%s2471_s1 + $0xc4] ss:$16 sps:$4 sm:$0xff]   ;;  %v1776_v7 = vld [vmem:[%s2471_s1 + $0xec] ss:$16 sps:$4 sm:$0xff]  }
   0x3   :  { %238 = vmatpush1.bf16.msra.mxu0 %v1753_v3  ;;  %v1765_v5 = vld [vmem:[%s2471_s1 + $0xc0] ss:$16 sps:$4 sm:$0xff]   ;;  %v1771_v6 = vld [vmem:[%s2471_s1 + $0xa4] ss:$16 sps:$4 sm:$0xff]   ;;  %v1781_v8 = vld [vmem:[%s2471_s1 + $0xe8] ss:$16 sps:$4 sm:$0xff]   ;;  %278 = vmatprep.subr.bf16.mxu1 %v1776_v7  ;;  %v219_v39 = vunpack.c.0.s8 %v218_v37 }
   0x4   :  { %239 = vmatprep.subr.bf16.mxu0 %v1759_v4  ;;  %v1787_v9 = vld [vmem:[%s2471_s1 + $0xa0] ss:$16 sps:$4 sm:$0xff]   ;;  %v1794_v10 = vld [vmem:[%s2471_s1 + $0x84] ss:$16 sps:$4 sm:$0xff]   ;;  %279 = vmatpush1.bf16.msra.mxu1 %v1781_v8  ;;  %v1800_v11 = vld [vmem:[%s2471_s1 + $0xcc] ss:$16 sps:$4 sm:$0xff]  }
   0x5   :  { %v1805_v12 = vld [vmem:[%s2471_s1 + $0xc8] ss:$16 sps:$4 sm:$0xff]   ;;  %280 = vmatprep.subr.bf16.mxu1 %v1800_v11  ;;  %v1812_v13 = vld [vmem:[%s2471_s1 + $0x80] ss:$16 sps:$4 sm:$0xff]   ;;  %v1817_v14 = vld [vmem:[%s2471_s1 + $0x64] ss:$16 sps:$4 sm:$0xff]  }
   0x6   :  { %v1822_v15 = vld [vmem:[%s2471_s1 + $0xac] ss:$16 sps:$4 sm:$0xff]   ;;  %v1829_v16 = vld [vmem:[%s2471_s1 + $0xa8] ss:$16 sps:$4 sm:$0xff]   ;;  %v1841_v18 = vld [vmem:[%s2471_s1 + $0x60] ss:$16 sps:$4 sm:$0xff]  }
   0x7   :  { %240 = vmatpush1.bf16.msra.mxu0 %v1765_v5  ;;  %v1835_v17 = vld [vmem:[%s2471_s1 + $0x8c] ss:$16 sps:$4 sm:$0xff]   ;;  %v1847_v19 = vld [vmem:[%s2471_s1 + $0x44] ss:$16 sps:$4 sm:$0xff]   ;;  %v1853_v20 = vld [vmem:[%s2471_s1 + $0x88] ss:$16 sps:$4 sm:$0xff]  }
   0x8   :  { %241 = vmatprep.subr.bf16.mxu0 %v1771_v6  ;;  %281 = vmatpush1.bf16.msra.mxu1 %v1805_v12  ;;  %v1859_v21 = vld [vmem:[%s2471_s1 + $0x6c] ss:$16 sps:$4 sm:$0xff]   ;;  %v1864_v22 = vld [vmem:[%s2471_s1 + $0x40] ss:$16 sps:$4 sm:$0xff]   ;;  %v1870_v23 = vld [vmem:[%s2471_s1 + $0x24] ss:$16 sps:$4 sm:$0xff]  }
   0x9   :  { %282 = vmatprep.subr.bf16.mxu1 %v1822_v15  ;;  %v1877_v24 = vld [vmem:[%s2471_s1 + $0x68] ss:$16 sps:$4 sm:$0xff]   ;;  %v1883_v25 = vld [vmem:[%s2471_s1 + $0x4c] ss:$16 sps:$4 sm:$0xff]   ;;  %v1889_v26 = vld [vmem:[%s2471_s1 + $0x20] ss:$16 sps:$4 sm:$0xff]  }
   0xa   :  { %v1895_v27 = vld [vmem:[%s2471_s1 + $0x4] ss:$16 sps:$4 sm:$0xff]   ;;  %v1901_v28 = vld [vmem:[%s2471_s1 + $0x48] ss:$16 sps:$4 sm:$0xff]   ;;  %v1907_v29 = vld [vmem:[%s2471_s1 + $0x2c] ss:$16 sps:$4 sm:$0xff]  }
   0xb   :  { %242 = vmatpush1.bf16.msra.mxu0 %v1787_v9  ;;  %v1913_v30 = vld [vmem:[%s2471_s1] ss:$16 sps:$4 sm:$0xff]   ;;  %v1920_v32 = vld [vmem:[%s2471_s1 + $0x28] ss:$16 sps:$4 sm:$0xff]   ;;  %v1926_v33 = vld [vmem:[%s2471_s1 + $0xc] ss:$16 sps:$4 sm:$0xff]  }
   0xc   :  { %243 = vmatprep.subr.bf16.mxu0 %v1794_v10  ;;  %283 = vmatpush1.bf16.msra.mxu1 %v1829_v16  ;;  %v50_v31 = vld [vmem:[#allocation2] sm:$0x3]  ;;  %v1933_v35 = vld [vmem:[%s2471_s1 + $0x8] ss:$16 sps:$4 sm:$0xff]   ;;  %v221_v40 = vshrl.u32 %v220_v38, 7 }
   0xd   :  { %284 = vmatprep.subr.bf16.mxu1 %v1835_v17  ;;  %v52_v34 = vpack.c.bf16 %v50_v31, %v50_v31  ;;  %v53_v41 = vld [vmem:[%s2472_s0] sm:$0xf] }
   0xe   :  { %v54_v42 = vunpack.c.l.bf16 %v53_v41  ;;  %v1976_v43 = vsub.s32 %v219_v39, %v221_v40  ;;  %v51_v40 = vld [vmem:[#allocation3] sm:$0x3] }
   0xf   :  { %244 = vmatpush1.bf16.msra.mxu0 %v1812_v13 }
  0x10   :  { %245 = vmatprep.subr.bf16.mxu0 %v1817_v14  ;;  %285 = vmatpush1.bf16.msra.mxu1 %v1853_v20  ;;  %v223_v44 = vrot.slane %v54_v42, %v1976_v43  ;;  %v216_v52 = vcombine.high %v54_v42, %v54_v42 }
  0x11   :  { %286 = vmatprep.subr.bf16.mxu1 %v1859_v21 }
  0x12   :  { %v231_v45 = vcombine.high %v223_v44, %v223_v44  ;;  %v230_v57 = vrot.slane %v216_v52, %v1976_v43 }
  0x13   :  { %246 = vmatpush1.bf16.msra.mxu0 %v1841_v18 }
  0x14   :  { %247 = vmatprep.subr.bf16.mxu0 %v1847_v19  ;;  %287 = vmatpush1.bf16.msra.mxu1 %v1877_v24  ;;  %v232_v61 = vcombine.high %v230_v57, %v230_v57 }
  0x15   :  { %288 = vmatprep.subr.bf16.mxu1 %v1883_v25 }
  0x17   :  { %248 = vmatpush1.bf16.msra.mxu0 %v1864_v22 }
  0x18   :  { %249 = vmatprep.subr.bf16.mxu0 %v1870_v23  ;;  %289 = vmatpush1.bf16.msra.mxu1 %v1901_v28 }
  0x19   :  { %290 = vmatprep.subr.bf16.mxu1 %v1907_v29 }
  0x1b   :  { %250 = vmatpush1.bf16.msra.mxu0 %v1889_v26 }
  0x1c   :  { %251 = vmatprep.subr.bf16.mxu0 %v1895_v27  ;;  %291 = vmatpush1.bf16.msra.mxu1 %v1920_v32 }
  0x1d   :  { %292 = vmatprep.subr.bf16.mxu1 %v1926_v33 }
  0x1f   :  { %252 = vmatpush1.bf16.msra.mxu0 %v1913_v30 }
  0x20   :  { %370 = vmatprep.subr.bf16.mxu0 %v1746_v0  ;;  %293 = vmatpush1.bf16.msra.mxu1 %v1933_v35 }
  0x21   :  { %411 = vmatprep.subr.bf16.mxu1 %v1776_v7 }
  0x22   :  { %270 = vmatmul.mubr.bf16.vlgmr.msra.gmra.mxu0 %v52_v34 }
  0x23   :  { %371 = vmatpush1.bf16.msra.mxu0 %v1753_v3  ;;  %402 = vmatprep.mubr.bf16.mxu0 %v1725_v1 }
  0x24   :  { %372 = vmatprep.subr.bf16.mxu0 %v1759_v4  ;;  %311 = vmatmul.mubr.bf16.vlgmr.msra.gmra.mxu1 %v52_v34 }
  0x25   :  { %412 = vmatpush1.bf16.msra.mxu1 %v1781_v8  ;;  %443 = vmatprep.mubr.bf16.mxu1 %v1725_v1 }
  0x26   :  { %413 = vmatprep.subr.bf16.mxu1 %v1800_v11 }
  0x27   :  { %373 = vmatpush1.bf16.msra.mxu0 %v1765_v5 }
  0x28   :  { %374 = vmatprep.subr.bf16.mxu0 %v1771_v6 }
  0x29   :  { %414 = vmatpush1.bf16.msra.mxu1 %v1805_v12 }
  0x2a   :  { %415 = vmatprep.subr.bf16.mxu1 %v1822_v15 }
  0x2b   :  { %375 = vmatpush1.bf16.msra.mxu0 %v1787_v9 }
  0x2c   :  { %376 = vmatprep.subr.bf16.mxu0 %v1794_v10 }
  0x2d   :  { %416 = vmatpush1.bf16.msra.mxu1 %v1829_v16 }
  0x2e   :  { %417 = vmatprep.subr.bf16.mxu1 %v1835_v17 }
  0x2f   :  { %377 = vmatpush1.bf16.msra.mxu0 %v1812_v13 }
  0x30   :  { %378 = vmatprep.subr.bf16.mxu0 %v1817_v14 }
  0x31   :  { %418 = vmatpush1.bf16.msra.mxu1 %v1853_v20 }
  0x32   :  { %419 = vmatprep.subr.bf16.mxu1 %v1859_v21 }
  0x33   :  { %379 = vmatpush1.bf16.msra.mxu0 %v1841_v18 }
  0x34   :  { %380 = vmatprep.subr.bf16.mxu0 %v1847_v19 }
  0x35   :  { %420 = vmatpush1.bf16.msra.mxu1 %v1877_v24 }
  0x36   :  { %421 = vmatprep.subr.bf16.mxu1 %v1883_v25 }
  0x37   :  { %381 = vmatpush1.bf16.msra.mxu0 %v1864_v22 }
  0x38   :  { %382 = vmatprep.subr.bf16.mxu0 %v1870_v23 }
  0x39   :  { %422 = vmatpush1.bf16.msra.mxu1 %v1901_v28 }
  0x3a   :  { %423 = vmatprep.subr.bf16.mxu1 %v1907_v29 }
  0x3b   :  { %383 = vmatpush1.bf16.msra.mxu0 %v1889_v26 }
  0x3c   :  { %384 = vmatprep.subr.bf16.mxu0 %v1895_v27 }
  0x3d   :  { %424 = vmatpush1.bf16.msra.mxu1 %v1920_v32 }
  0x3e   :  { %425 = vmatprep.subr.bf16.mxu1 %v1926_v33 }
  0x3f   :  { %385 = vmatpush1.bf16.msra.mxu0 %v1913_v30 }
  0x40   :  { %504 = vmatprep.subr.bf16.mxu0 %v1746_v0 }
  0x41   :  { %426 = vmatpush1.bf16.msra.mxu1 %v1933_v35 }
  0x42   :  { %545 = vmatprep.subr.bf16.mxu1 %v1776_v7 }
  0xe2   :  { %v271_v46 = vpop.f32.mrf.mxu0 }
  0xe3   :  { %v272_v47 = vadd.f32 %v271_v46, %v223_v44 }
  0xe4   :  { %v273_v48 = vpop.f32.mrf.mxu0  ;;  %v312_v54 = vpop.f32.mrf.mxu1 }
  0xe5   :  { %v1455_v49 = vmul.f32 -1.442695, %v272_v47  ;;  %v274_v50 = vadd.f32 %v273_v48, %v231_v45  ;;  %v313_v59 = vadd.f32 %v312_v54, %v230_v57 }
  0xe6   :  { %v275_v51 = vpop.f32.mrf.mxu0  ;;  %v314_v56 = vpop.f32.mrf.mxu1 }
  0xe7   :  { %1549 = vpow2.f32 %v1455_v49  ;;  %v1456_v53 = vmul.f32 -1.442695, %v274_v50  ;;  %v1457_v62 = vmul.f32 -1.442695, %v313_v59  ;;  %v315_v63 = vadd.f32 %v314_v56, %v232_v61  ;;  %v2023_v51 = vld [vmem:[%s2472_s0 + $0x4] sm:$0xff]  }
  0xe8   :  { %v276_v55 = vpop.f32.mrf.mxu0  ;;  %v316_v58 = vpop.f32.mrf.mxu1  ;;  %v347_v52 = vunpack.c.l.bf16 %v2023_v51 }
  0xe9   :  { %1551 = vpow2.f32 %v1456_v53 }
  0xea   :  { %v317_v60 = vpop.f32.mrf.mxu1  ;;  %1553 = vpow2.f32 %v1457_v62  ;;  %v356_v53 = vrot.slane %v347_v52, %v1976_v43  ;;  %v349_v62 = vcombine.high %v347_v52, %v347_v52 }
  0xeb   :  { %1555 = vtanh.f32 %v315_v63 }
  0xec   :  { %v364_v54 = vcombine.high %v356_v53, %v356_v53 }
  0xf4   :  { %v1550_v2 = vpop.eup %1549 }
  0xf5   :  { %v328_v31 = vadd.f32 1.0, %v1550_v2 }
  0xf6   :  { %v1552_v34 = vpop.eup %1551 }
  0xf7   :  { %1557 = vrcp.f32 %v328_v31  ;;  %v329_v36 = vadd.f32 1.0, %v1552_v34  ;;  %v1554_v37 = vpop.eup %1553 }
  0xf8   :  { %v1556_v38 = vpop.eup %1555  ;;  %v330_v42 = vadd.f32 1.0, %v1554_v37  ;;  %v363_v37 = vrot.slane %v349_v62, %v1976_v43 }
  0xf9   :  { %1559 = vrcp.f32 %v329_v36 }
  0xfa   :  { %1561 = vrcp.f32 %v330_v42 }
 0x104   :  { %v1558_v39 = vpop.eup %1557 }
 0x105   :  { %v339_v45 = vmul.f32 %v1558_v39, %v1556_v38  ;;  %v365_v39 = vcombine.high %v363_v37, %v363_v37 }
 0x106   :  { %v1560_v41 = vpop.eup %1559 }
 0x107   :  { %v338_v44 = vmul.f32 %v1560_v41, %v51_v40  ;;  %v1562_v47 = vpop.eup %1561 }
 0x109   :  { %v1980_v46 = vadd.f32 %v339_v45, %v338_v44 }
 0x10b   :  { %1563 = vtanh.f32 %v1980_v46 }
 0x118   :  { %v1564_v48 = vpop.eup %1563 }
 0x119   :  { %v342_v49 = vmul.f32 %v1564_v48, %v1562_v47 }
 0x11b   :  { %v343_v50 = vpack.c.bf16 %v342_v49, %v342_v49 }
 0x11d   :  { %344 = vst [vmem:[%s2473_s2] sm:$0x1] %v343_v50  ;;  %403 = vmatmul.mubr.bf16.vlgmr.msra.gmra.mxu0 %v343_v50  ;;  %444 = vmatmul.mubr.bf16.vlgmr.msra.gmra.mxu1 %v343_v50 }
 0x11e   :  { %505 = vmatpush1.bf16.msra.mxu0 %v1753_v3  ;;  %546 = vmatpush1.bf16.msra.mxu1 %v1781_v8 }
 0x11f   :  { %506 = vmatprep.subr.bf16.mxu0 %v1759_v4  ;;  %547 = vmatprep.subr.bf16.mxu1 %v1800_v11 }
 0x120   :  { %536 = vmatprep.mubr.bf16.mxu0 %v1725_v1  ;;  %577 = vmatprep.mubr.bf16.mxu1 %v1725_v1 }
 0x122   :  { %507 = vmatpush1.bf16.msra.mxu0 %v1765_v5  ;;  %548 = vmatpush1.bf16.msra.mxu1 %v1805_v12 }
 0x123   :  { %508 = vmatprep.subr.bf16.mxu0 %v1771_v6  ;;  %549 = vmatprep.subr.bf16.mxu1 %v1822_v15 }
 0x126   :  { %509 = vmatpush1.bf16.msra.mxu0 %v1787_v9  ;;  %550 = vmatpush1.bf16.msra.mxu1 %v1829_v16 }
 0x127   :  { %510 = vmatprep.subr.bf16.mxu0 %v1794_v10  ;;  %551 = vmatprep.subr.bf16.mxu1 %v1835_v17 }
 0x12a   :  { %511 = vmatpush1.bf16.msra.mxu0 %v1812_v13  ;;  %552 = vmatpush1.bf16.msra.mxu1 %v1853_v20 }
 0x12b   :  { %512 = vmatprep.subr.bf16.mxu0 %v1817_v14  ;;  %553 = vmatprep.subr.bf16.mxu1 %v1859_v21 }
 0x12e   :  { %513 = vmatpush1.bf16.msra.mxu0 %v1841_v18  ;;  %554 = vmatpush1.bf16.msra.mxu1 %v1877_v24 }
 0x12f   :  { %514 = vmatprep.subr.bf16.mxu0 %v1847_v19  ;;  %555 = vmatprep.subr.bf16.mxu1 %v1883_v25 }
 0x132   :  { %515 = vmatpush1.bf16.msra.mxu0 %v1864_v22  ;;  %556 = vmatpush1.bf16.msra.mxu1 %v1901_v28 }
 0x133   :  { %516 = vmatprep.subr.bf16.mxu0 %v1870_v23  ;;  %557 = vmatprep.subr.bf16.mxu1 %v1907_v29 }
 0x136   :  { %517 = vmatpush1.bf16.msra.mxu0 %v1889_v26  ;;  %558 = vmatpush1.bf16.msra.mxu1 %v1920_v32 }
 0x137   :  { %518 = vmatprep.subr.bf16.mxu0 %v1895_v27  ;;  %559 = vmatprep.subr.bf16.mxu1 %v1926_v33 }
 0x13a   :  { %519 = vmatpush1.bf16.msra.mxu0 %v1913_v30  ;;  %560 = vmatpush1.bf16.msra.mxu1 %v1933_v35 }
 0x13b   :  { %638 = vmatprep.subr.bf16.mxu0 %v1746_v0  ;;  %679 = vmatprep.subr.bf16.mxu1 %v1776_v7 }
 0x1dd   :  { %v404_v55 = vpop.f32.mrf.mxu0  ;;  %v445_v56 = vpop.f32.mrf.mxu1 }
 0x1de   :  { %v405_v57 = vadd.f32 %v404_v55, %v356_v53  ;;  %v446_v38 = vadd.f32 %v445_v56, %v363_v37 }
 0x1df   :  { %v406_v58 = vpop.f32.mrf.mxu0  ;;  %v447_v59 = vpop.f32.mrf.mxu1 }
 0x1e0   :  { %v1459_v60 = vmul.f32 -1.442695, %v405_v57  ;;  %v407_v61 = vadd.f32 %v406_v58, %v364_v54  ;;  %v1461_v40 = vmul.f32 -1.442695, %v446_v38  ;;  %v448_v42 = vadd.f32 %v447_v59, %v365_v39 }
 0x1e1   :  { %v408_v63 = vpop.f32.mrf.mxu0  ;;  %v449_v2 = vpop.f32.mrf.mxu1 }
 0x1e2   :  { %1565 = vpow2.f32 %v1459_v60  ;;  %v1460_v31 = vmul.f32 -1.442695, %v407_v61 }
 0x1e3   :  { %v409_v34 = vpop.f32.mrf.mxu0  ;;  %v450_v36 = vpop.f32.mrf.mxu1 }
 0x1e4   :  { %1567 = vpow2.f32 %v1460_v31 }
 0x1e5   :  { %1569 = vpow2.f32 %v1461_v40 }
 0x1ef   :  { %v1566_v41 = vpop.eup %1565 }
 0x1f0   :  { %v461_v44 = vadd.f32 1.0, %v1566_v41 }
 0x1f1   :  { %v1568_v45 = vpop.eup %1567 }
 0x1f2   :  { %1571 = vrcp.f32 %v461_v44  ;;  %v462_v47 = vadd.f32 1.0, %v1568_v45  ;;  %v1570_v48 = vpop.eup %1569 }
 0x1f3   :  { %1573 = vtanh.f32 %v448_v42  ;;  %v463_v53 = vadd.f32 1.0, %v1570_v48 }
 0x1f4   :  { %1575 = vrcp.f32 %v462_v47 }
 0x1f5   :  { %1577 = vrcp.f32 %v463_v53 }
 0x1ff   :  { %v1572_v49 = vpop.eup %1571 }
 0x200   :  { %v1574_v50 = vpop.eup %1573 }
 0x201   :  { %v1576_v52 = vpop.eup %1575  ;;  %v472_v55 = vmul.f32 %v1574_v50, %v1572_v49 }
 0x202   :  { %v471_v54 = vmul.f32 %v1576_v52, %v1980_v46  ;;  %v1578_v57 = vpop.eup %1577  ;;  %v481_v46 = vunpack.c.h.bf16 %v2023_v51 }
 0x204   :  { %v2029_v56 = vadd.f32 %v472_v55, %v471_v54  ;;  %v490_v61 = vrot.slane %v481_v46, %v1976_v43  ;;  %v483_v39 = vcombine.high %v481_v46, %v481_v46 }
 0x206   :  { %1579 = vtanh.f32 %v2029_v56  ;;  %v498_v62 = vcombine.high %v490_v61, %v490_v61  ;;  %v497_v51 = vrot.slane %v483_v39, %v1976_v43 }
 0x208   :  { %v499_v48 = vcombine.high %v497_v51, %v497_v51 }
 0x213   :  { %v1580_v58 = vpop.eup %1579 }
 0x214   :  { %v475_v59 = vmul.f32 %v1580_v58, %v1578_v57 }
 0x216   :  { %v476_v60 = vpack.c.bf16 %v475_v59, %v475_v59 }
 0x218   :  { %1462 = vst [vmem:[%s2473_s2 + $0x1] sm:$0x1] %v476_v60  ;;  %537 = vmatmul.mubr.bf16.vlgmr.msra.gmra.mxu0 %v476_v60  ;;  %578 = vmatmul.mubr.bf16.vlgmr.msra.gmra.mxu1 %v476_v60 }
 0x219   :  { %639 = vmatpush1.bf16.msra.mxu0 %v1753_v3  ;;  %680 = vmatpush1.bf16.msra.mxu1 %v1781_v8 }
 0x21a   :  { %640 = vmatprep.subr.bf16.mxu0 %v1759_v4  ;;  %681 = vmatprep.subr.bf16.mxu1 %v1800_v11 }
 0x21b   :  { %670 = vmatprep.mubr.bf16.mxu0 %v1725_v1  ;;  %711 = vmatprep.mubr.bf16.mxu1 %v1725_v1 }
 0x21d   :  { %641 = vmatpush1.bf16.msra.mxu0 %v1765_v5  ;;  %682 = vmatpush1.bf16.msra.mxu1 %v1805_v12 }
 0x21e   :  { %642 = vmatprep.subr.bf16.mxu0 %v1771_v6  ;;  %683 = vmatprep.subr.bf16.mxu1 %v1822_v15 }
 0x221   :  { %643 = vmatpush1.bf16.msra.mxu0 %v1787_v9  ;;  %684 = vmatpush1.bf16.msra.mxu1 %v1829_v16 }
 0x222   :  { %644 = vmatprep.subr.bf16.mxu0 %v1794_v10  ;;  %685 = vmatprep.subr.bf16.mxu1 %v1835_v17 }
 0x225   :  { %645 = vmatpush1.bf16.msra.mxu0 %v1812_v13  ;;  %686 = vmatpush1.bf16.msra.mxu1 %v1853_v20 }
 0x226   :  { %646 = vmatprep.subr.bf16.mxu0 %v1817_v14  ;;  %687 = vmatprep.subr.bf16.mxu1 %v1859_v21 }
 0x229   :  { %647 = vmatpush1.bf16.msra.mxu0 %v1841_v18  ;;  %688 = vmatpush1.bf16.msra.mxu1 %v1877_v24 }
 0x22a   :  { %648 = vmatprep.subr.bf16.mxu0 %v1847_v19  ;;  %689 = vmatprep.subr.bf16.mxu1 %v1883_v25 }
 0x22d   :  { %649 = vmatpush1.bf16.msra.mxu0 %v1864_v22  ;;  %690 = vmatpush1.bf16.msra.mxu1 %v1901_v28 }
 0x22e   :  { %650 = vmatprep.subr.bf16.mxu0 %v1870_v23  ;;  %691 = vmatprep.subr.bf16.mxu1 %v1907_v29 }
 0x231   :  { %651 = vmatpush1.bf16.msra.mxu0 %v1889_v26  ;;  %692 = vmatpush1.bf16.msra.mxu1 %v1920_v32 }
 0x232   :  { %652 = vmatprep.subr.bf16.mxu0 %v1895_v27  ;;  %693 = vmatprep.subr.bf16.mxu1 %v1926_v33 }
 0x235   :  { %653 = vmatpush1.bf16.msra.mxu0 %v1913_v30  ;;  %694 = vmatpush1.bf16.msra.mxu1 %v1933_v35 }
 0x236   :  { %772 = vmatprep.subr.bf16.mxu0 %v1746_v0  ;;  %813 = vmatprep.subr.bf16.mxu1 %v1776_v7 }
 0x2d8   :  { %v538_v63 = vpop.f32.mrf.mxu0  ;;  %v579_v2 = vpop.f32.mrf.mxu1 }
 0x2d9   :  { %v539_v31 = vadd.f32 %v538_v63, %v490_v61  ;;  %v580_v47 = vadd.f32 %v579_v2, %v497_v51 }
 0x2da   :  { %v540_v34 = vpop.f32.mrf.mxu0  ;;  %v581_v36 = vpop.f32.mrf.mxu1 }
 0x2db   :  { %v1464_v37 = vmul.f32 -1.442695, %v539_v31  ;;  %v541_v38 = vadd.f32 %v540_v34, %v498_v62  ;;  %v1466_v49 = vmul.f32 -1.442695, %v580_v47  ;;  %v582_v52 = vadd.f32 %v581_v36, %v499_v48 }
 0x2dc   :  { %v542_v40 = vpop.f32.mrf.mxu0  ;;  %v583_v41 = vpop.f32.mrf.mxu1 }
 0x2dd   :  { %1581 = vpow2.f32 %v1464_v37  ;;  %v1465_v42 = vmul.f32 -1.442695, %v541_v38 }
 0x2de   :  { %v543_v44 = vpop.f32.mrf.mxu0  ;;  %v584_v45 = vpop.f32.mrf.mxu1 }
 0x2df   :  { %1583 = vpow2.f32 %v1465_v42 }
 0x2e0   :  { %1585 = vpow2.f32 %v1466_v49 }
 0x2ea   :  { %v1582_v50 = vpop.eup %1581 }
 0x2eb   :  { %v595_v53 = vadd.f32 1.0, %v1582_v50 }
 0x2ec   :  { %v1584_v54 = vpop.eup %1583 }
 0x2ed   :  { %1587 = vrcp.f32 %v595_v53  ;;  %v596_v55 = vadd.f32 1.0, %v1584_v54  ;;  %v1586_v57 = vpop.eup %1585 }
 0x2ee   :  { %1589 = vtanh.f32 %v582_v52  ;;  %v597_v46 = vadd.f32 1.0, %v1586_v57 }
 0x2ef   :  { %1591 = vrcp.f32 %v596_v55 }
 0x2f0   :  { %1593 = vrcp.f32 %v597_v46 }
 0x2fa   :  { %v1588_v58 = vpop.eup %1587 }
 0x2fb   :  { %v1590_v59 = vpop.eup %1589 }
 0x2fc   :  { %v1592_v60 = vpop.eup %1591  ;;  %v606_v62 = vmul.f32 %v1590_v59, %v1588_v58 }
 0x2fd   :  { %v605_v61 = vmul.f32 %v1592_v60, %v2029_v56  ;;  %v1594_v2 = vpop.eup %1593  ;;  %v2116_v56 = vld [vmem:[%s2472_s0 + $0xc] sm:$0xff]  }
 0x2fe   :  { %v615_v37 = vunpack.c.l.bf16 %v2116_v56 }
 0x2ff   :  { %v2073_v63 = vadd.f32 %v606_v62, %v605_v61 }
 0x300   :  { %v624_v38 = vrot.slane %v615_v37, %v1976_v43  ;;  %v617_v48 = vcombine.high %v615_v37, %v615_v37 }
 0x301   :  { %1595 = vtanh.f32 %v2073_v63 }
 0x302   :  { %v632_v39 = vcombine.high %v624_v38, %v624_v38  ;;  %v631_v55 = vrot.slane %v617_v48, %v1976_v43 }
 0x304   :  { %v633_v58 = vcombine.high %v631_v55, %v631_v55 }
 0x30e   :  { %v1596_v31 = vpop.eup %1595 }
 0x30f   :  { %v609_v34 = vmul.f32 %v1596_v31, %v1594_v2 }
 0x311   :  { %v610_v36 = vpack.c.bf16 %v609_v34, %v609_v34 }
 0x313   :  { %1467 = vst [vmem:[%s2473_s2 + $0x2] sm:$0x1] %v610_v36  ;;  %671 = vmatmul.mubr.bf16.vlgmr.msra.gmra.mxu0 %v610_v36  ;;  %712 = vmatmul.mubr.bf16.vlgmr.msra.gmra.mxu1 %v610_v36 }
 0x314   :  { %773 = vmatpush1.bf16.msra.mxu0 %v1753_v3  ;;  %814 = vmatpush1.bf16.msra.mxu1 %v1781_v8 }
 0x315   :  { %774 = vmatprep.subr.bf16.mxu0 %v1759_v4  ;;  %815 = vmatprep.subr.bf16.mxu1 %v1800_v11 }
 0x316   :  { %804 = vmatprep.mubr.bf16.mxu0 %v1725_v1  ;;  %845 = vmatprep.mubr.bf16.mxu1 %v1725_v1 }
 0x318   :  { %775 = vmatpush1.bf16.msra.mxu0 %v1765_v5  ;;  %816 = vmatpush1.bf16.msra.mxu1 %v1805_v12 }
 0x319   :  { %776 = vmatprep.subr.bf16.mxu0 %v1771_v6  ;;  %817 = vmatprep.subr.bf16.mxu1 %v1822_v15 }
 0x31c   :  { %777 = vmatpush1.bf16.msra.mxu0 %v1787_v9  ;;  %818 = vmatpush1.bf16.msra.mxu1 %v1829_v16 }
 0x31d   :  { %778 = vmatprep.subr.bf16.mxu0 %v1794_v10  ;;  %819 = vmatprep.subr.bf16.mxu1 %v1835_v17 }
 0x320   :  { %779 = vmatpush1.bf16.msra.mxu0 %v1812_v13  ;;  %820 = vmatpush1.bf16.msra.mxu1 %v1853_v20 }
 0x321   :  { %780 = vmatprep.subr.bf16.mxu0 %v1817_v14  ;;  %821 = vmatprep.subr.bf16.mxu1 %v1859_v21 }
 0x324   :  { %781 = vmatpush1.bf16.msra.mxu0 %v1841_v18  ;;  %822 = vmatpush1.bf16.msra.mxu1 %v1877_v24 }
 0x325   :  { %782 = vmatprep.subr.bf16.mxu0 %v1847_v19  ;;  %823 = vmatprep.subr.bf16.mxu1 %v1883_v25 }
 0x328   :  { %783 = vmatpush1.bf16.msra.mxu0 %v1864_v22  ;;  %824 = vmatpush1.bf16.msra.mxu1 %v1901_v28 }
 0x329   :  { %784 = vmatprep.subr.bf16.mxu0 %v1870_v23  ;;  %825 = vmatprep.subr.bf16.mxu1 %v1907_v29 }
 0x32c   :  { %785 = vmatpush1.bf16.msra.mxu0 %v1889_v26  ;;  %826 = vmatpush1.bf16.msra.mxu1 %v1920_v32 }
 0x32d   :  { %786 = vmatprep.subr.bf16.mxu0 %v1895_v27  ;;  %827 = vmatprep.subr.bf16.mxu1 %v1926_v33 }
 0x330   :  { %787 = vmatpush1.bf16.msra.mxu0 %v1913_v30  ;;  %828 = vmatpush1.bf16.msra.mxu1 %v1933_v35 }
 0x331   :  { %906 = vmatprep.subr.bf16.mxu0 %v1746_v0  ;;  %947 = vmatprep.subr.bf16.mxu1 %v1776_v7 }
 0x3d3   :  { %v672_v40 = vpop.f32.mrf.mxu0  ;;  %v713_v41 = vpop.f32.mrf.mxu1 }
 0x3d4   :  { %v673_v42 = vadd.f32 %v672_v40, %v624_v38  ;;  %v714_v57 = vadd.f32 %v713_v41, %v631_v55 }
 0x3d5   :  { %v674_v44 = vpop.f32.mrf.mxu0  ;;  %v715_v45 = vpop.f32.mrf.mxu1 }
 0x3d6   :  { %v1469_v51 = vmul.f32 -1.442695, %v673_v42  ;;  %v675_v47 = vadd.f32 %v674_v44, %v632_v39  ;;  %v1471_v59 = vmul.f32 -1.442695, %v714_v57  ;;  %v716_v46 = vadd.f32 %v715_v45, %v633_v58 }
 0x3d7   :  { %v676_v49 = vpop.f32.mrf.mxu0  ;;  %v717_v50 = vpop.f32.mrf.mxu1 }
 0x3d8   :  { %1597 = vpow2.f32 %v1469_v51  ;;  %v1470_v52 = vmul.f32 -1.442695, %v675_v47 }
 0x3d9   :  { %v677_v53 = vpop.f32.mrf.mxu0  ;;  %v718_v54 = vpop.f32.mrf.mxu1 }
 0x3da   :  { %1599 = vpow2.f32 %v1470_v52 }
 0x3db   :  { %1601 = vpow2.f32 %v1471_v59 }
 0x3e5   :  { %v1598_v60 = vpop.eup %1597 }
 0x3e6   :  { %v729_v61 = vadd.f32 1.0, %v1598_v60 }
 0x3e7   :  { %v1600_v62 = vpop.eup %1599 }
 0x3e8   :  { %1603 = vrcp.f32 %v729_v61  ;;  %v730_v2 = vadd.f32 1.0, %v1600_v62  ;;  %v1602_v31 = vpop.eup %1601 }
 0x3e9   :  { %1605 = vtanh.f32 %v716_v46  ;;  %v731_v38 = vadd.f32 1.0, %v1602_v31 }
 0x3ea   :  { %1607 = vrcp.f32 %v730_v2 }
 0x3eb   :  { %1609 = vrcp.f32 %v731_v38 }
 0x3f5   :  { %v1604_v34 = vpop.eup %1603 }
 0x3f6   :  { %v1606_v36 = vpop.eup %1605 }
 0x3f7   :  { %v1608_v37 = vpop.eup %1607  ;;  %v740_v40 = vmul.f32 %v1606_v36, %v1604_v34 }
 0x3f8   :  { %v739_v39 = vmul.f32 %v1608_v37, %v2073_v63  ;;  %v1610_v42 = vpop.eup %1609 }
 0x3fa   :  { %v2122_v41 = vadd.f32 %v740_v40, %v739_v39 }
 0x3fc   :  { %1611 = vtanh.f32 %v2122_v41 }
 0x409   :  { %v1612_v44 = vpop.eup %1611 }
 0x40a   :  { %v743_v45 = vmul.f32 %v1612_v44, %v1610_v42 }
 0x40c   :  { %v744_v51 = vpack.c.bf16 %v743_v45, %v743_v45 }
 0x40e   :  { %1472 = vst [vmem:[%s2473_s2 + $0x3] sm:$0x1] %v744_v51  ;;  %805 = vmatmul.mubr.bf16.vlgmr.msra.gmra.mxu0 %v744_v51  ;;  %846 = vmatmul.mubr.bf16.vlgmr.msra.gmra.mxu1 %v744_v51 }
 0x40f   :  { %907 = vmatpush1.bf16.msra.mxu0 %v1753_v3  ;;  %948 = vmatpush1.bf16.msra.mxu1 %v1781_v8  ;;  %v749_v3 = vunpack.c.h.bf16 %v2116_v56 }
 0x410   :  { %908 = vmatprep.subr.bf16.mxu0 %v1759_v4  ;;  %949 = vmatprep.subr.bf16.mxu1 %v1800_v11 }
 0x411   :  { %938 = vmatprep.mubr.bf16.mxu0 %v1725_v1  ;;  %979 = vmatprep.mubr.bf16.mxu1 %v1725_v1  ;;  %v758_v4 = vrot.slane %v749_v3, %v1976_v43  ;;  %v751_v52 = vcombine.high %v749_v3, %v749_v3 }
 0x413   :  { %909 = vmatpush1.bf16.msra.mxu0 %v1765_v5  ;;  %950 = vmatpush1.bf16.msra.mxu1 %v1805_v12  ;;  %v766_v5 = vcombine.high %v758_v4, %v758_v4 }
 0x414   :  { %910 = vmatprep.subr.bf16.mxu0 %v1771_v6  ;;  %951 = vmatprep.subr.bf16.mxu1 %v1822_v15 }
 0x417   :  { %911 = vmatpush1.bf16.msra.mxu0 %v1787_v9  ;;  %952 = vmatpush1.bf16.msra.mxu1 %v1829_v16 }
 0x418   :  { %912 = vmatprep.subr.bf16.mxu0 %v1794_v10  ;;  %953 = vmatprep.subr.bf16.mxu1 %v1835_v17 }
 0x41b   :  { %913 = vmatpush1.bf16.msra.mxu0 %v1812_v13  ;;  %954 = vmatpush1.bf16.msra.mxu1 %v1853_v20 }
 0x41c   :  { %914 = vmatprep.subr.bf16.mxu0 %v1817_v14  ;;  %955 = vmatprep.subr.bf16.mxu1 %v1859_v21 }
 0x41f   :  { %915 = vmatpush1.bf16.msra.mxu0 %v1841_v18  ;;  %956 = vmatpush1.bf16.msra.mxu1 %v1877_v24 }
 0x420   :  { %916 = vmatprep.subr.bf16.mxu0 %v1847_v19  ;;  %957 = vmatprep.subr.bf16.mxu1 %v1883_v25 }
 0x423   :  { %917 = vmatpush1.bf16.msra.mxu0 %v1864_v22  ;;  %958 = vmatpush1.bf16.msra.mxu1 %v1901_v28 }
 0x424   :  { %918 = vmatprep.subr.bf16.mxu0 %v1870_v23  ;;  %959 = vmatprep.subr.bf16.mxu1 %v1907_v29 }
 0x427   :  { %919 = vmatpush1.bf16.msra.mxu0 %v1889_v26  ;;  %960 = vmatpush1.bf16.msra.mxu1 %v1920_v32 }
 0x428   :  { %920 = vmatprep.subr.bf16.mxu0 %v1895_v27  ;;  %961 = vmatprep.subr.bf16.mxu1 %v1926_v33 }
 0x42b   :  { %921 = vmatpush1.bf16.msra.mxu0 %v1913_v30  ;;  %962 = vmatpush1.bf16.msra.mxu1 %v1933_v35 }
 0x42c   :  { %1040 = vmatprep.subr.bf16.mxu0 %v1746_v0  ;;  %1081 = vmatprep.subr.bf16.mxu1 %v1776_v7  ;;  %v765_v7 = vrot.slane %v751_v52, %v1976_v43 }
 0x42e   :  { %v767_v58 = vcombine.high %v765_v7, %v765_v7 }
 0x4ce   :  { %v806_v6 = vpop.f32.mrf.mxu0  ;;  %v847_v9 = vpop.f32.mrf.mxu1 }
 0x4cf   :  { %v807_v63 = vadd.f32 %v806_v6, %v758_v4  ;;  %v848_v56 = vadd.f32 %v847_v9, %v765_v7  ;;  %v2182_v4 = vld [vmem:[%s2471_s1 + $0xc4] ss:$16 sps:$4 sm:$0xff]  }
 0x4d0   :  { %v808_v47 = vpop.f32.mrf.mxu0  ;;  %v849_v48 = vpop.f32.mrf.mxu1 }
 0x4d1   :  { %v1474_v49 = vmul.f32 -1.442695, %v807_v63  ;;  %v809_v50 = vadd.f32 %v808_v47, %v766_v5  ;;  %v1476_v59 = vmul.f32 -1.442695, %v848_v56  ;;  %v850_v46 = vadd.f32 %v849_v48, %v767_v58  ;;  %v2191_v5 = vld [vmem:[%s2471_s1 + $0xc0] ss:$16 sps:$4 sm:$0xff]  }
 0x4d2   :  { %v810_v53 = vpop.f32.mrf.mxu0  ;;  %v851_v54 = vpop.f32.mrf.mxu1 }
 0x4d3   :  { %1613 = vpow2.f32 %v1474_v49  ;;  %v1475_v55 = vmul.f32 -1.442695, %v809_v50 }
 0x4d4   :  { %v811_v0 = vpop.f32.mrf.mxu0  ;;  %v852_v57 = vpop.f32.mrf.mxu1 }
 0x4d5   :  { %1615 = vpow2.f32 %v1475_v55 }
 0x4d6   :  { %1617 = vpow2.f32 %v1476_v59 }
 0x4e0   :  { %v1614_v60 = vpop.eup %1613 }
 0x4e1   :  { %v863_v61 = vadd.f32 1.0, %v1614_v60  ;;  %v2260_v60 = vld [vmem:[%s2471_s1 + $0xe8] ss:$16 sps:$4 sm:$0xff]  }
 0x4e2   :  { %v1616_v62 = vpop.eup %1615 }
 0x4e3   :  { %1619 = vrcp.f32 %v863_v61  ;;  %v864_v2 = vadd.f32 1.0, %v1616_v62  ;;  %v1618_v31 = vpop.eup %1617  ;;  %v2276_v61 = vld [vmem:[%s2471_s1 + $0xc8] ss:$16 sps:$4 sm:$0xff]   ;;  %v2283_v62 = vld [vmem:[%s2471_s1 + $0xac] ss:$16 sps:$4 sm:$0xff]  }
 0x4e4   :  { %1621 = vtanh.f32 %v850_v46  ;;  %v865_v38 = vadd.f32 1.0, %v1618_v31  ;;  %v2267_v46 = vld [vmem:[%s2471_s1 + $0xcc] ss:$16 sps:$4 sm:$0xff]   ;;  %v2296_v31 = vld [vmem:[%s2471_s1 + $0x84] ss:$16 sps:$4 sm:$0xff]  }
 0x4e5   :  { %1623 = vrcp.f32 %v864_v2  ;;  %v2290_v2 = vld [vmem:[%s2471_s1 + $0xa8] ss:$16 sps:$4 sm:$0xff]  }
 0x4e6   :  { %1625 = vrcp.f32 %v865_v38  ;;  %v2320_v38 = vld [vmem:[%s2471_s1 + $0x64] ss:$16 sps:$4 sm:$0xff]  }
 0x4f0   :  { %v1620_v34 = vpop.eup %1619 }
 0x4f1   :  { %v1622_v36 = vpop.eup %1621 }
 0x4f2   :  { %v1624_v37 = vpop.eup %1623  ;;  %v874_v40 = vmul.f32 %v1622_v36, %v1620_v34  ;;  %v2302_v34 = vld [vmem:[%s2471_s1 + $0x8c] ss:$16 sps:$4 sm:$0xff]   ;;  %v2308_v36 = vld [vmem:[%s2471_s1 + $0x80] ss:$16 sps:$4 sm:$0xff]  }
 0x4f3   :  { %v873_v39 = vmul.f32 %v1624_v37, %v2122_v41  ;;  %v1626_v44 = vpop.eup %1625  ;;  %v2175_v41 = vld [vmem:[%s2471_s1 + $0xe0] ss:$16 sps:$4 sm:$0xff]   ;;  %v2314_v37 = vld [vmem:[%s2471_s1 + $0x88] ss:$16 sps:$4 sm:$0xff]  }
 0x4f5   :  { %v2166_v42 = vadd.f32 %v874_v40, %v873_v39  ;;  %v2326_v39 = vld [vmem:[%s2471_s1 + $0x6c] ss:$16 sps:$4 sm:$0xff]   ;;  %v2332_v40 = vld [vmem:[%s2471_s1 + $0x60] ss:$16 sps:$4 sm:$0xff]  }
 0x4f7   :  { %1627 = vtanh.f32 %v2166_v42 }
 0x504   :  { %v1628_v45 = vpop.eup %1627 }
 0x505   :  { %v877_v51 = vmul.f32 %v1628_v45, %v1626_v44  ;;  %v2344_v44 = vld [vmem:[%s2471_s1 + $0x44] ss:$16 sps:$4 sm:$0xff]   ;;  %v2350_v45 = vld [vmem:[%s2471_s1 + $0x4c] ss:$16 sps:$4 sm:$0xff]  }
 0x507   :  { %v878_v3 = vpack.c.bf16 %v877_v51, %v877_v51  ;;  %v2356_v51 = vld [vmem:[%s2471_s1 + $0x40] ss:$16 sps:$4 sm:$0xff]  }
 0x509   :  { %1477 = vst [vmem:[%s2473_s2 + $0x4] sm:$0x1] %v878_v3  ;;  %939 = vmatmul.mubr.bf16.vlgmr.msra.gmra.mxu0 %v878_v3  ;;  %980 = vmatmul.mubr.bf16.vlgmr.msra.gmra.mxu1 %v878_v3  ;;  %v2362_v3 = vld [vmem:[%s2471_s1 + $0x48] ss:$16 sps:$4 sm:$0xff]  }
 0x50a   :  { %1041 = vmatpush1.bf16.msra.mxu0 %v2175_v41  ;;  %1082 = vmatpush1.bf16.msra.mxu1 %v1781_v8  ;;  %v2198_v8 = vld [vmem:[%s2471_s1 + $0xa4] ss:$16 sps:$4 sm:$0xff]  }
 0x50b   :  { %1042 = vmatprep.subr.bf16.mxu0 %v2182_v4  ;;  %1083 = vmatprep.subr.bf16.mxu1 %v1800_v11  ;;  %v2205_v11 = vld [vmem:[%s2471_s1 + $0xa0] ss:$16 sps:$4 sm:$0xff]  }
 0x50c   :  { %1072 = vmatprep.mubr.bf16.mxu0 %v1725_v1  ;;  %1113 = vmatprep.mubr.bf16.mxu1 %v1725_v1 }
 0x50e   :  { %1043 = vmatpush1.bf16.msra.mxu0 %v2191_v5  ;;  %1084 = vmatpush1.bf16.msra.mxu1 %v1805_v12  ;;  %v2238_v12 = vld [vmem:[%s2471_s1 + $0xec] ss:$16 sps:$4 sm:$0xff]  }
 0x50f   :  { %1044 = vmatprep.subr.bf16.mxu0 %v2198_v8  ;;  %1085 = vmatprep.subr.bf16.mxu1 %v1822_v15 }
 0x512   :  { %1045 = vmatpush1.bf16.msra.mxu0 %v2205_v11  ;;  %1086 = vmatpush1.bf16.msra.mxu1 %v1829_v16 }
 0x513   :  { %1046 = vmatprep.subr.bf16.mxu0 %v1794_v10  ;;  %1087 = vmatprep.subr.bf16.mxu1 %v1835_v17  ;;  %v2232_v10 = vld [vmem:[%s2471_s1 + $0xe4] ss:$16 sps:$4 sm:$0xff]  }
 0x516   :  { %1047 = vmatpush1.bf16.msra.mxu0 %v1812_v13  ;;  %1088 = vmatpush1.bf16.msra.mxu1 %v1853_v20  ;;  %v2244_v13 = vld [vmem:[%s2472_s0 + $0x14] sm:$0xff]  }
 0x517   :  { %1048 = vmatprep.subr.bf16.mxu0 %v1817_v14  ;;  %1089 = vmatprep.subr.bf16.mxu1 %v1859_v21  ;;  %v883_v14 = vunpack.c.l.bf16 %v2244_v13 }
 0x519   :  { %v892_v15 = vrot.slane %v883_v14, %v1976_v43 }
 0x51a   :  { %1049 = vmatpush1.bf16.msra.mxu0 %v1841_v18  ;;  %1090 = vmatpush1.bf16.msra.mxu1 %v1877_v24  ;;  %v885_v24 = vcombine.high %v883_v14, %v883_v14  ;;  %v2368_v14 = vld [vmem:[%s2471_s1 + $0x24] ss:$16 sps:$4 sm:$0xff]  }
 0x51b   :  { %1050 = vmatprep.subr.bf16.mxu0 %v1847_v19  ;;  %1091 = vmatprep.subr.bf16.mxu1 %v1883_v25  ;;  %v900_v16 = vcombine.high %v892_v15, %v892_v15 }
 0x51e   :  { %1051 = vmatpush1.bf16.msra.mxu0 %v1864_v22  ;;  %1092 = vmatpush1.bf16.msra.mxu1 %v1901_v28 }
 0x51f   :  { %1052 = vmatprep.subr.bf16.mxu0 %v1870_v23  ;;  %1093 = vmatprep.subr.bf16.mxu1 %v1907_v29 }
 0x522   :  { %1053 = vmatpush1.bf16.msra.mxu0 %v1889_v26  ;;  %1094 = vmatpush1.bf16.msra.mxu1 %v1920_v32 }
 0x523   :  { %1054 = vmatprep.subr.bf16.mxu0 %v1895_v27  ;;  %1095 = vmatprep.subr.bf16.mxu1 %v1926_v33 }
 0x526   :  { %1055 = vmatpush1.bf16.msra.mxu0 %v1913_v30  ;;  %1096 = vmatpush1.bf16.msra.mxu1 %v1933_v35  ;;  %v899_v30 = vrot.slane %v885_v24, %v1976_v43 }
 0x527   :  { %1174 = vmatprep.subr.bf16.mxu0 %v2232_v10  ;;  %1215 = vmatprep.subr.bf16.mxu1 %v2238_v12 }
 0x528   :  { %v901_v33 = vcombine.high %v899_v30, %v899_v30 }
 0x5c9   :  { %v940_v17 = vpop.f32.mrf.mxu0  ;;  %v981_v18 = vpop.f32.mrf.mxu1 }
 0x5ca   :  { %v941_v19 = vadd.f32 %v940_v17, %v892_v15  ;;  %v982_v32 = vadd.f32 %v981_v18, %v899_v30  ;;  %v2374_v15 = vld [vmem:[%s2471_s1 + $0x2c] ss:$16 sps:$4 sm:$0xff]   ;;  %v2386_v17 = vld [vmem:[%s2471_s1 + $0x28] ss:$16 sps:$4 sm:$0xff]   ;;  %v2392_v18 = vld [vmem:[%s2471_s1 + $0x4] ss:$16 sps:$4 sm:$0xff]  }
 0x5cb   :  { %v942_v20 = vpop.f32.mrf.mxu0  ;;  %v983_v21 = vpop.f32.mrf.mxu1 }
 0x5cc   :  { %v1479_v22 = vmul.f32 -1.442695, %v941_v19  ;;  %v943_v23 = vadd.f32 %v942_v20, %v900_v16  ;;  %v1481_v35 = vmul.f32 -1.442695, %v982_v32  ;;  %v984_v9 = vadd.f32 %v983_v21, %v901_v33  ;;  %v2380_v16 = vld [vmem:[%s2471_s1 + $0x20] ss:$16 sps:$4 sm:$0xff]  }
 0x5cd   :  { %v944_v25 = vpop.f32.mrf.mxu0  ;;  %v985_v26 = vpop.f32.mrf.mxu1  ;;  %v2398_v19 = vld [vmem:[%s2471_s1 + $0xc] ss:$16 sps:$4 sm:$0xff]   ;;  %v2404_v20 = vld [vmem:[%s2471_s1] ss:$16 sps:$4 sm:$0xff]   ;;  %v2410_v21 = vld [vmem:[%s2471_s1 + $0x8] ss:$16 sps:$4 sm:$0xff]  }
 0x5ce   :  { %1629 = vpow2.f32 %v1479_v22  ;;  %v1480_v27 = vmul.f32 -1.442695, %v943_v23  ;;  %v1017_v22 = vunpack.c.h.bf16 %v2244_v13 }
 0x5cf   :  { %v945_v28 = vpop.f32.mrf.mxu0  ;;  %v986_v29 = vpop.f32.mrf.mxu1 }
 0x5d0   :  { %1631 = vpow2.f32 %v1480_v27  ;;  %v1026_v23 = vrot.slane %v1017_v22, %v1976_v43  ;;  %v1019_v33 = vcombine.high %v1017_v22, %v1017_v22 }
 0x5d1   :  { %1633 = vpow2.f32 %v1481_v35 }
 0x5d2   :  { %v1034_v24 = vcombine.high %v1026_v23, %v1026_v23 }
 0x5db   :  { %v1630_v6 = vpop.eup %1629 }
 0x5dc   :  { %v997_v63 = vadd.f32 1.0, %v1630_v6 }
 0x5dd   :  { %v1632_v47 = vpop.eup %1631 }
 0x5de   :  { %1635 = vrcp.f32 %v997_v63  ;;  %v998_v48 = vadd.f32 1.0, %v1632_v47  ;;  %v1634_v49 = vpop.eup %1633 }
 0x5df   :  { %1637 = vtanh.f32 %v984_v9  ;;  %v999_v54 = vadd.f32 1.0, %v1634_v49 }
 0x5e0   :  { %1639 = vrcp.f32 %v998_v48 }
 0x5e1   :  { %1641 = vrcp.f32 %v999_v54 }
 0x5eb   :  { %v1636_v50 = vpop.eup %1635 }
 0x5ec   :  { %v1638_v52 = vpop.eup %1637 }
 0x5ed   :  { %v1640_v53 = vpop.eup %1639  ;;  %v1008_v0 = vmul.f32 %v1638_v52, %v1636_v50 }
 0x5ee   :  { %v1007_v55 = vmul.f32 %v1640_v53, %v2166_v42  ;;  %v1642_v7 = vpop.eup %1641  ;;  %v2338_v42 = vld [vmem:[%s2471_s1 + $0x68] ss:$16 sps:$4 sm:$0xff]  }
 0x5f0   :  { %v2250_v57 = vadd.f32 %v1008_v0, %v1007_v55 }
 0x5f2   :  { %1643 = vtanh.f32 %v2250_v57 }
 0x5ff   :  { %v1644_v56 = vpop.eup %1643 }
 0x600   :  { %v1011_v58 = vmul.f32 %v1644_v56, %v1642_v7 }
 0x602   :  { %v1012_v59 = vpack.c.bf16 %v1011_v58, %v1011_v58 }
 0x604   :  { %1482 = vst [vmem:[%s2473_s2 + $0x5] sm:$0x1] %v1012_v59  ;;  %1073 = vmatmul.mubr.bf16.vlgmr.msra.gmra.mxu0 %v1012_v59  ;;  %1114 = vmatmul.mubr.bf16.vlgmr.msra.gmra.mxu1 %v1012_v59 }
 0x605   :  { %1175 = vmatpush1.bf16.msra.mxu0 %v2175_v41  ;;  %1216 = vmatpush1.bf16.msra.mxu1 %v2260_v60 }
 0x606   :  { %1176 = vmatprep.subr.bf16.mxu0 %v2182_v4  ;;  %1217 = vmatprep.subr.bf16.mxu1 %v2267_v46 }
 0x607   :  { %1206 = vmatprep.mubr.bf16.mxu0 %v1725_v1  ;;  %1247 = vmatprep.mubr.bf16.mxu1 %v1725_v1 }
 0x609   :  { %1177 = vmatpush1.bf16.msra.mxu0 %v2191_v5  ;;  %1218 = vmatpush1.bf16.msra.mxu1 %v2276_v61 }
 0x60a   :  { %1178 = vmatprep.subr.bf16.mxu0 %v2198_v8  ;;  %1219 = vmatprep.subr.bf16.mxu1 %v2283_v62 }
 0x60d   :  { %1179 = vmatpush1.bf16.msra.mxu0 %v2205_v11  ;;  %1220 = vmatpush1.bf16.msra.mxu1 %v2290_v2 }
 0x60e   :  { %1180 = vmatprep.subr.bf16.mxu0 %v2296_v31  ;;  %1221 = vmatprep.subr.bf16.mxu1 %v2302_v34 }
 0x611   :  { %1181 = vmatpush1.bf16.msra.mxu0 %v2308_v36  ;;  %1222 = vmatpush1.bf16.msra.mxu1 %v2314_v37 }
 0x612   :  { %1182 = vmatprep.subr.bf16.mxu0 %v2320_v38  ;;  %1223 = vmatprep.subr.bf16.mxu1 %v2326_v39 }
 0x615   :  { %1183 = vmatpush1.bf16.msra.mxu0 %v2332_v40  ;;  %1224 = vmatpush1.bf16.msra.mxu1 %v2338_v42 }
 0x616   :  { %1184 = vmatprep.subr.bf16.mxu0 %v2344_v44  ;;  %1225 = vmatprep.subr.bf16.mxu1 %v2350_v45 }
 0x619   :  { %1185 = vmatpush1.bf16.msra.mxu0 %v2356_v51  ;;  %1226 = vmatpush1.bf16.msra.mxu1 %v2362_v3 }
 0x61a   :  { %1186 = vmatprep.subr.bf16.mxu0 %v2368_v14  ;;  %1227 = vmatprep.subr.bf16.mxu1 %v2374_v15 }
 0x61d   :  { %1187 = vmatpush1.bf16.msra.mxu0 %v2380_v16  ;;  %1228 = vmatpush1.bf16.msra.mxu1 %v2386_v17 }
 0x61e   :  { %1188 = vmatprep.subr.bf16.mxu0 %v2392_v18  ;;  %1229 = vmatprep.subr.bf16.mxu1 %v2398_v19 }
 0x621   :  { %1189 = vmatpush1.bf16.msra.mxu0 %v2404_v20  ;;  %1230 = vmatpush1.bf16.msra.mxu1 %v2410_v21 }
 0x622   :  { %1308 = vmatprep.subr.bf16.mxu0 %v2232_v10  ;;  %1349 = vmatprep.subr.bf16.mxu1 %v2238_v12  ;;  %v1033_v12 = vrot.slane %v1019_v33, %v1976_v43 }
 0x624   :  { %v1035_v47 = vcombine.high %v1033_v12, %v1033_v12 }
 0x6c4   :  { %v1074_v25 = vpop.f32.mrf.mxu0  ;;  %v1115_v26 = vpop.f32.mrf.mxu1 }
 0x6c5   :  { %v1075_v27 = vadd.f32 %v1074_v25, %v1026_v23  ;;  %v1116_v13 = vadd.f32 %v1115_v26, %v1033_v12 }
 0x6c6   :  { %v1076_v28 = vpop.f32.mrf.mxu0  ;;  %v1117_v29 = vpop.f32.mrf.mxu1 }
 0x6c7   :  { %v1484_v30 = vmul.f32 -1.442695, %v1075_v27  ;;  %v1077_v32 = vadd.f32 %v1076_v28, %v1034_v24  ;;  %v1486_v48 = vmul.f32 -1.442695, %v1116_v13  ;;  %v1118_v50 = vadd.f32 %v1117_v29, %v1035_v47 }
 0x6c8   :  { %v1078_v35 = vpop.f32.mrf.mxu0  ;;  %v1119_v6 = vpop.f32.mrf.mxu1 }
 0x6c9   :  { %1645 = vpow2.f32 %v1484_v30  ;;  %v1485_v9 = vmul.f32 -1.442695, %v1077_v32 }
 0x6ca   :  { %v1079_v10 = vpop.f32.mrf.mxu0  ;;  %v1120_v63 = vpop.f32.mrf.mxu1 }
 0x6cb   :  { %1647 = vpow2.f32 %v1485_v9 }
 0x6cc   :  { %1649 = vpow2.f32 %v1486_v48 }
 0x6d6   :  { %v1646_v49 = vpop.eup %1645 }
 0x6d7   :  { %v1131_v52 = vadd.f32 1.0, %v1646_v49 }
 0x6d8   :  { %v1648_v53 = vpop.eup %1647 }
 0x6d9   :  { %1651 = vrcp.f32 %v1131_v52  ;;  %v1132_v54 = vadd.f32 1.0, %v1648_v53  ;;  %v1650_v55 = vpop.eup %1649 }
 0x6da   :  { %1653 = vtanh.f32 %v1118_v50  ;;  %v1133_v58 = vadd.f32 1.0, %v1650_v55 }
 0x6db   :  { %1655 = vrcp.f32 %v1132_v54 }
 0x6dc   :  { %1657 = vrcp.f32 %v1133_v58 }
 0x6e6   :  { %v1652_v0 = vpop.eup %1651 }
 0x6e7   :  { %v1654_v7 = vpop.eup %1653 }
 0x6e8   :  { %v1656_v56 = vpop.eup %1655  ;;  %v1142_v22 = vmul.f32 %v1654_v7, %v1652_v0 }
 0x6e9   :  { %v1141_v59 = vmul.f32 %v1656_v56, %v2250_v57  ;;  %v1658_v24 = vpop.eup %1657 }
 0x6eb   :  { %v2419_v23 = vadd.f32 %v1142_v22, %v1141_v59 }
 0x6ed   :  { %1659 = vtanh.f32 %v2419_v23 }
 0x6fa   :  { %v1660_v25 = vpop.eup %1659 }
 0x6fb   :  { %v1145_v26 = vmul.f32 %v1660_v25, %v1658_v24 }
 0x6fd   :  { %v1146_v27 = vpack.c.bf16 %v1145_v26, %v1145_v26 }
 0x6ff   :  { %1487 = vst [vmem:[%s2473_s2 + $0x6] sm:$0x1] %v1146_v27  ;;  %1207 = vmatmul.mubr.bf16.vlgmr.msra.gmra.mxu0 %v1146_v27  ;;  %1248 = vmatmul.mubr.bf16.vlgmr.msra.gmra.mxu1 %v1146_v27 }
 0x700   :  { %1309 = vmatpush1.bf16.msra.mxu0 %v2175_v41  ;;  %1350 = vmatpush1.bf16.msra.mxu1 %v2260_v60 }
 0x701   :  { %1310 = vmatprep.subr.bf16.mxu0 %v2182_v4  ;;  %1351 = vmatprep.subr.bf16.mxu1 %v2267_v46 }
 0x702   :  { %1340 = vmatprep.mubr.bf16.mxu0 %v1725_v1  ;;  %1381 = vmatprep.mubr.bf16.mxu1 %v1725_v1  ;;  %v1488_v1 = vld [vmem:[%s2472_s0 + $0x1c] sm:$0xff]  }
 0x703   :  { %v1151_v41 = vunpack.c.l.bf16 %v1488_v1  ;;  %v1285_v6 = vunpack.c.h.bf16 %v1488_v1 }
 0x704   :  { %1311 = vmatpush1.bf16.msra.mxu0 %v2191_v5  ;;  %1352 = vmatpush1.bf16.msra.mxu1 %v2276_v61 }
 0x705   :  { %1312 = vmatprep.subr.bf16.mxu0 %v2198_v8  ;;  %1353 = vmatprep.subr.bf16.mxu1 %v2283_v62  ;;  %v1160_v4 = vrot.slane %v1151_v41, %v1976_v43  ;;  %v1294_v9 = vrot.slane %v1285_v6, %v1976_v43  ;;  %v1287_v52 = vcombine.high %v1285_v6, %v1285_v6 }
 0x707   :  { %v1168_v5 = vcombine.high %v1160_v4, %v1160_v4  ;;  %v1302_v10 = vcombine.high %v1294_v9, %v1294_v9  ;;  %v1301_v56 = vrot.slane %v1287_v52, %v1976_v43 }
 0x708   :  { %1313 = vmatpush1.bf16.msra.mxu0 %v2205_v11  ;;  %1354 = vmatpush1.bf16.msra.mxu1 %v2290_v2  ;;  %v1153_v2 = vcombine.high %v1151_v41, %v1151_v41 }
 0x709   :  { %1314 = vmatprep.subr.bf16.mxu0 %v2296_v31  ;;  %1355 = vmatprep.subr.bf16.mxu1 %v2302_v34  ;;  %v1303_v59 = vcombine.high %v1301_v56, %v1301_v56 }
 0x70c   :  { %1315 = vmatpush1.bf16.msra.mxu0 %v2308_v36  ;;  %1356 = vmatpush1.bf16.msra.mxu1 %v2314_v37 }
 0x70d   :  { %1316 = vmatprep.subr.bf16.mxu0 %v2320_v38  ;;  %1357 = vmatprep.subr.bf16.mxu1 %v2326_v39  ;;  %v1167_v39 = vrot.slane %v1153_v2, %v1976_v43 }
 0x710   :  { %1317 = vmatpush1.bf16.msra.mxu0 %v2332_v40  ;;  %1358 = vmatpush1.bf16.msra.mxu1 %v2338_v42  ;;  %v1169_v42 = vcombine.high %v1167_v39, %v1167_v39 }
 0x711   :  { %1318 = vmatprep.subr.bf16.mxu0 %v2344_v44  ;;  %1359 = vmatprep.subr.bf16.mxu1 %v2350_v45 }
 0x714   :  { %1319 = vmatpush1.bf16.msra.mxu0 %v2356_v51  ;;  %1360 = vmatpush1.bf16.msra.mxu1 %v2362_v3 }
 0x715   :  { %1320 = vmatprep.subr.bf16.mxu0 %v2368_v14  ;;  %1361 = vmatprep.subr.bf16.mxu1 %v2374_v15 }
 0x718   :  { %1321 = vmatpush1.bf16.msra.mxu0 %v2380_v16  ;;  %1362 = vmatpush1.bf16.msra.mxu1 %v2386_v17 }
 0x719   :  { %1322 = vmatprep.subr.bf16.mxu0 %v2392_v18  ;;  %1363 = vmatprep.subr.bf16.mxu1 %v2398_v19 }
 0x71c   :  { %1323 = vmatpush1.bf16.msra.mxu0 %v2404_v20  ;;  %1364 = vmatpush1.bf16.msra.mxu1 %v2410_v21 }
 0x7bf   :  { %v1208_v8 = vpop.f32.mrf.mxu0  ;;  %v1249_v11 = vpop.f32.mrf.mxu1 }
 0x7c0   :  { %v1209_v57 = vadd.f32 %v1208_v8, %v1160_v4  ;;  %v1250_v40 = vadd.f32 %v1249_v11, %v1167_v39 }
 0x7c1   :  { %v1210_v60 = vpop.f32.mrf.mxu0  ;;  %v1251_v46 = vpop.f32.mrf.mxu1 }
 0x7c2   :  { %v1489_v61 = vmul.f32 -1.442695, %v1209_v57  ;;  %v1211_v62 = vadd.f32 %v1210_v60, %v1168_v5  ;;  %v1491_v44 = vmul.f32 -1.442695, %v1250_v40  ;;  %v1252_v51 = vadd.f32 %v1251_v46, %v1169_v42 }
 0x7c3   :  { %v1212_v31 = vpop.f32.mrf.mxu0  ;;  %v1253_v34 = vpop.f32.mrf.mxu1 }
 0x7c4   :  { %1661 = vpow2.f32 %v1489_v61  ;;  %v1490_v36 = vmul.f32 -1.442695, %v1211_v62 }
 0x7c5   :  { %v1213_v37 = vpop.f32.mrf.mxu0  ;;  %v1254_v38 = vpop.f32.mrf.mxu1 }
 0x7c6   :  { %1663 = vpow2.f32 %v1490_v36 }
 0x7c7   :  { %1665 = vpow2.f32 %v1491_v44 }
 0x7d1   :  { %v1662_v45 = vpop.eup %1661 }
 0x7d2   :  { %v1265_v3 = vadd.f32 1.0, %v1662_v45 }
 0x7d3   :  { %v1664_v14 = vpop.eup %1663 }
 0x7d4   :  { %1667 = vrcp.f32 %v1265_v3  ;;  %v1266_v15 = vadd.f32 1.0, %v1664_v14  ;;  %v1666_v16 = vpop.eup %1665 }
 0x7d5   :  { %1669 = vtanh.f32 %v1252_v51  ;;  %v1267_v20 = vadd.f32 1.0, %v1666_v16 }
 0x7d6   :  { %1671 = vrcp.f32 %v1266_v15 }
 0x7d7   :  { %1673 = vrcp.f32 %v1267_v20 }
 0x7e1   :  { %v1668_v17 = vpop.eup %1667 }
 0x7e2   :  { %v1670_v18 = vpop.eup %1669 }
 0x7e3   :  { %v1672_v19 = vpop.eup %1671  ;;  %v1276_v28 = vmul.f32 %v1670_v18, %v1668_v17 }
 0x7e4   :  { %v1275_v21 = vmul.f32 %v1672_v19, %v2419_v23  ;;  %v1674_v30 = vpop.eup %1673 }
 0x7e6   :  { %v1277_v29 = vadd.f32 %v1276_v28, %v1275_v21 }
 0x7e8   :  { %1675 = vtanh.f32 %v1277_v29 }
 0x7f5   :  { %v1676_v32 = vpop.eup %1675 }
 0x7f6   :  { %v1279_v33 = vmul.f32 %v1676_v32, %v1674_v30 }
 0x7f8   :  { %v1280_v35 = vpack.c.bf16 %v1279_v33, %v1279_v33 }
 0x7fa   :  { %1492 = vst [vmem:[%s2473_s2 + $0x7] sm:$0x1] %v1280_v35  ;;  %1341 = vmatmul.mubr.bf16.vlgmr.msra.gmra.mxu0 %v1280_v35  ;;  %1382 = vmatmul.mubr.bf16.vlgmr.msra.gmra.mxu1 %v1280_v35 }
 0x8ba   :  { %v1342_v63 = vpop.f32.mrf.mxu0  ;;  %v1383_v12 = vpop.f32.mrf.mxu1 }
 0x8bb   :  { %v1343_v13 = vadd.f32 %v1342_v63, %v1294_v9  ;;  %v1384_v58 = vadd.f32 %v1383_v12, %v1301_v56 }
 0x8bc   :  { %v1344_v47 = vpop.f32.mrf.mxu0  ;;  %v1385_v48 = vpop.f32.mrf.mxu1 }
 0x8bd   :  { %v1494_v49 = vmul.f32 -1.442695, %v1343_v13  ;;  %v1345_v50 = vadd.f32 %v1344_v47, %v1302_v10  ;;  %v1496_v22 = vmul.f32 -1.442695, %v1384_v58  ;;  %v1386_v24 = vadd.f32 %v1385_v48, %v1303_v59 }
 0x8be   :  { %v1346_v53 = vpop.f32.mrf.mxu0  ;;  %v1387_v54 = vpop.f32.mrf.mxu1 }
 0x8bf   :  { %1677 = vpow2.f32 %v1494_v49  ;;  %v1495_v55 = vmul.f32 -1.442695, %v1345_v50 }
 0x8c0   :  { %v1347_v0 = vpop.f32.mrf.mxu0  ;;  %v1388_v7 = vpop.f32.mrf.mxu1 }
 0x8c1   :  { %1679 = vpow2.f32 %v1495_v55 }
 0x8c2   :  { %1681 = vpow2.f32 %v1496_v22 }
 0x8cc   :  { %v1678_v23 = vpop.eup %1677 }
 0x8cd   :  { %v1399_v25 = vadd.f32 1.0, %v1678_v23 }
 0x8ce   :  { %v1680_v26 = vpop.eup %1679 }
 0x8cf   :  { %1683 = vrcp.f32 %v1399_v25  ;;  %v1400_v27 = vadd.f32 1.0, %v1680_v26  ;;  %v1682_v1 = vpop.eup %1681 }
 0x8d0   :  { %1685 = vtanh.f32 %v1386_v24  ;;  %v1401_v8 = vadd.f32 1.0, %v1682_v1 }
 0x8d1   :  { %1687 = vrcp.f32 %v1400_v27 }
 0x8d2   :  { %1689 = vrcp.f32 %v1401_v8 }
 0x8dc   :  { %v1684_v41 = vpop.eup %1683 }
 0x8dd   :  { %v1686_v4 = vpop.eup %1685 }
 0x8de   :  { %v1688_v5 = vpop.eup %1687  ;;  %v1410_v57 = vmul.f32 %v1686_v4, %v1684_v41 }
 0x8df   :  { %v1409_v11 = vmul.f32 %v1688_v5, %v1277_v29  ;;  %v1690_v60 = vpop.eup %1689 }
 0x8e1   :  { %v1411_v43 = vadd.f32 %v1410_v57, %v1409_v11 }
 0x8e3   :  { %1691 = vtanh.f32 %v1411_v43  ;;  %1418 = vst [vmem:[#allocation3] sm:$0x3] %v1411_v43 }
 0x8f0   :  { %v1692_v46 = vpop.eup %1691 }
 0x8f1   :  { %v1413_v61 = vmul.f32 %v1692_v46, %v1690_v60 }
 0x8f3   :  { %v1414_v62 = vpack.c.bf16 %v1413_v61, %v1413_v61  ;;  %1417 = vst [vmem:[#allocation2] sm:$0x3] %v1413_v61 }
 0x8f5   :  { %1497 = vst [vmem:[%s2473_s2 + $0x8] sm:$0x1] %v1414_v62 }

</bundles_post_ra>
